<compile_context>
chip_gen: v6e
topology: v6e:2x2x1
jax: 0.10.0
libtpu: 0.0.40
codegen_flags: <defaults>
</compile_context>

<pallas_src>
import functools

import jax
import jax.numpy as jnp
from jax.experimental import pallas as pl
from jax.experimental.pallas import tpu as pltpu


def _round_up(x, m):
    return (x + m - 1) // m * m


# --------------------------------------------------------------------------
# Generic tiled matmul + bias + optional ReLU kernel
# --------------------------------------------------------------------------
def _matmul_bias_act_kernel(a_ref, b_ref, bias_ref, o_ref, acc_ref, *,
                            apply_relu):
    """Computes one (TM, TN) output tile; K is the last ('arbitrary') axis."""
    k = pl.program_id(2)

    @pl.when(k == 0)
    def _():
        acc_ref[...] = jnp.zeros_like(acc_ref)

    acc_ref[...] += jnp.dot(a_ref[...], b_ref[...],
                            preferred_element_type=jnp.float32)

    # Bias + activation only on the last K step (off the hot MXU/DMA path).
    @pl.when(k == pl.num_programs(2) - 1)
    def _():
        out = acc_ref[...] + bias_ref[...]          # (1, TN) broadcast, f32
        if apply_relu:
            out = jnp.maximum(out, 0.0)
        o_ref[...] = out.astype(o_ref.dtype)


def matmul_bias_act(a, b, bias, *, apply_relu, out_dtype,
                    tm=256, tn=128, tk=128):
    """out = act(a @ b + bias) via a tiled Pallas TPU kernel.

    a: (M, K)   b: (K, N)   bias: (N,)
    Operands are cast to bf16 (f32 MXU accumulation) and zero-padded to
    tile-aligned shapes, so stores are always lane-dense (N padded to >=128).

    Tile geometry: tn/tk multiples of 128 match the v5e MXU (4x128^2); at
    production channel counts (>=256) use tn=tk=256 for v6e/v7x (2x256^2).
    tm=256 keeps (2x double-buffered A/B tiles + f32 acc + out tile) far
    below the 32 MiB default scoped VMEM on all generations; raise tm on
    v5e/v6e (128 MiB VMEM) if the pipeline is DMA-exposed.
    """
    M, K = a.shape
    K2, N = b.shape
    assert K == K2 and bias.shape == (N,)

    Mp, Kp, Np = _round_up(M, tm), _round_up(K, tk), _round_up(N, tn)
    a_p = jnp.pad(a.astype(jnp.bfloat16), ((0, Mp - M), (0, Kp - K)))
    b_p = jnp.pad(b.astype(jnp.bfloat16), ((0, Kp - K), (0, Np - N)))
    bias_p = jnp.pad(bias.astype(jnp.float32), (0, Np - N)).reshape(1, Np)

    grid = (Mp // tm, Np // tn, Kp // tk)
    out = pl.pallas_call(
        functools.partial(_matmul_bias_act_kernel, apply_relu=apply_relu),
        out_shape=jax.ShapeDtypeStruct((Mp, Np), out_dtype),
        grid_spec=pltpu.PrefetchScalarGridSpec(
            num_scalar_prefetch=0,
            grid=grid,
            in_specs=[
                pl.BlockSpec((tm, tk), lambda i, j, k: (i, k)),
                pl.BlockSpec((tk, tn), lambda i, j, k: (k, j)),
                pl.BlockSpec((1, tn), lambda i, j, k: (0, j)),
            ],
            out_specs=pl.BlockSpec((tm, tn), lambda i, j, k: (i, j)),
            scratch_shapes=[pltpu.VMEM((tm, tn), jnp.float32)],
        ),
        compiler_params=pltpu.CompilerParams(
            dimension_semantics=("parallel", "parallel", "arbitrary")),
    )(a_p, b_p, bias_p)
    return out[:M, :N]


# --------------------------------------------------------------------------
# Conv layers expressed as matmuls
# --------------------------------------------------------------------------
def _im2col(x_nhwc, kh, kw):
    """'same'/stride-1 patches with taps folded into the channel (K) axis.

    (N, H, W, C) -> (N*H*W, kh*kw*C); column order is tap-major, channel-minor.
    """
    # TODO(synk): replace this HBM-materialized im2col with in-kernel halo
    # loading (shifted slices of a padded VMEM tile) to cut input DMA ~9x.
    n, h, w, c = x_nhwc.shape
    ph, pw = kh // 2, kw // 2
    xp = jnp.pad(x_nhwc, ((0, 0), (ph, ph), (pw, pw), (0, 0)))
    taps = [xp[:, i:i + h, j:j + w, :] for i in range(kh) for j in range(kw)]
    return jnp.concatenate(taps, axis=-1).reshape(n * h * w, kh * kw * c)


def _w_to_mat(w_oihw):
    """(Cout, Cin, KH, KW) -> (KH*KW*Cin, Cout), matching _im2col's layout."""
    cout, cin, kh, kw = w_oihw.shape
    return jnp.transpose(w_oihw, (2, 3, 1, 0)).reshape(kh * kw * cin, cout)


def conv3x3_relu(x_nhwc, w, b, *, out_dtype=jnp.bfloat16):
    """ConvModule: 3x3 'same' conv + bias + ReLU as one tiled matmul."""
    n, hh, ww, _ = x_nhwc.shape
    cout, _, kh, kw = w.shape
    out = matmul_bias_act(_im2col(x_nhwc, kh, kw), _w_to_mat(w), b,
                          apply_relu=True, out_dtype=out_dtype)
    return out.reshape(n, hh, ww, cout)


def conv_cat_relu(x_nhwc, h_nhwc, w, b, *, out_dtype=jnp.bfloat16):
    """conv_cat over channel-concat([x, h]) WITHOUT materializing the NHWC
    concat: the two im2col operands are joined on K and accumulated into one
    scratch by the K-tiled kernel (two partial contractions)."""
    n, hh, ww, cx = x_nhwc.shape
    cout, _, kh, kw = w.shape
    a = jnp.concatenate([_im2col(x_nhwc, kh, kw), _im2col(h_nhwc, kh, kw)],
                        axis=-1)
    b_mat = jnp.concatenate([_w_to_mat(w[:, :cx]), _w_to_mat(w[:, cx:])],
                            axis=0)
    out = matmul_bias_act(a, b_mat, b, apply_relu=True, out_dtype=out_dtype)
    return out.reshape(n, hh, ww, cout)


def conv1x1(x_nhwc, w, b, *, out_dtype=jnp.float32):
    """conv_seg: 1x1 conv == plain matmul, no pad/im2col; Cout is padded to
    128 inside matmul_bias_act so the logits store is lane-dense."""
    n, hh, ww, cin = x_nhwc.shape
    cout = w.shape[0]
    a = x_nhwc.reshape(n * hh * ww, cin)
    b_mat = jnp.transpose(w[:, :, 0, 0], (1, 0))            # (Cin, Cout)
    out = matmul_bias_act(a, b_mat, b, apply_relu=False, out_dtype=out_dtype)
    return out.reshape(n, hh, ww, cout)


# --------------------------------------------------------------------------
# FCNHead forward + params
# --------------------------------------------------------------------------
def init_params(key, in_channels, channels, num_classes, kernel_size):
    """Deterministic synthetic parameters matching FCNHead's module shapes."""
    ks = jax.random.split(key, 4)

    def conv_p(k, cin, cout, kh, kw, scale=0.05):
        kw_, kb_ = jax.random.split(k)
        w = scale * jax.random.normal(kw_, (cout, cin, kh, kw), jnp.float32)
        bb = scale * jax.random.normal(kb_, (cout,), jnp.float32)
        return w, bb

    return {
        # self.convs[0]: ConvModule(in_channels -> channels, k=3, pad=1) + ReLU
        "conv0": conv_p(ks[0], in_channels, channels, kernel_size, kernel_size),
        # self.convs[1]: ConvModule(channels -> channels, k=3, pad=1) + ReLU
        "conv1": conv_p(ks[1], channels, channels, kernel_size, kernel_size),
        # self.conv_cat: ConvModule(in_channels+channels -> channels) + ReLU
        "conv_cat": conv_p(ks[2], in_channels + channels, channels,
                           kernel_size, kernel_size),
        # self.conv_seg: Conv2d(channels -> num_classes, k=1)
        "conv_seg": conv_p(ks[3], channels, num_classes, 1, 1),
    }


def fcn_head_forward(params, x_nchw):
    # PyTorch conv input is NCHW; kernels use NHWC internally.
    x = jnp.transpose(x_nchw, (0, 2, 3, 1))                    # NHWC
    h = conv3x3_relu(x, *params["conv0"])                      # convs[0]
    h = conv3x3_relu(h, *params["conv1"])                      # convs[1]
    h = conv_cat_relu(x, h, *params["conv_cat"])                # concat_input
    # Dropout2d(0.1): identity at inference time.
    # TODO(synk): training-mode Dropout2d (random channel drop) not implemented.
    logits = conv1x1(h, *params["conv_seg"])                   # conv_seg
    return jnp.transpose(logits, (0, 3, 1, 2))                 # back to NCHW


if __name__ == "__main__":
    key = jax.random.PRNGKey(0)
    k_x, k_p = jax.random.split(key)

    N, Cin, H, W = 2, 4, 16, 16
    channels, num_classes = 32, 8

    x = jax.random.normal(k_x, (N, Cin, H, W), jnp.float32)
    params = init_params(k_p, Cin, channels, num_classes, kernel_size=3)

    out = jax.jit(functools.partial(fcn_head_forward, params))(x)
    out = jax.block_until_ready(out)
    assert out.shape == (N, num_classes, H, W), out.shape
    assert jnp.all(jnp.isfinite(out))
    print("KERNEL_OK")
</pallas_src>

<mosaic_0001>
module attributes {stable_mosaic.version = 11 : i64} {
  func.func @_matmul_bias_act_kernel(%arg0: i32, %arg1: i32, %arg2: i32, %arg3: memref<256x128xbf16, #tpu.memory_space<vmem>>, %arg4: memref<128x128xbf16, #tpu.memory_space<vmem>>, %arg5: memref<1x128xf32, #tpu.memory_space<vmem>>, %arg6: memref<256x128xbf16, #tpu.memory_space<vmem>>, %arg7: memref<256x128xf32, #tpu.memory_space<vmem>>) attributes {dimension_semantics = [#tpu.dimension_semantics<parallel>, #tpu.dimension_semantics<parallel>, #tpu.dimension_semantics<arbitrary>], iteration_bounds = array<i64: 2, 1, 1>, scalar_prefetch = 0 : i64, scratch_operands = 1 : i64, tpu.core_type = #tpu.core_type<tc>, window_params = [{transform_indices = @transform_0, window_bounds = array<i64: 256, 128>}, {transform_indices = @transform_1, window_bounds = array<i64: 128, 128>}, {transform_indices = @transform_2, window_bounds = array<i64: 1, 128>}, {transform_indices = @transform_3, window_bounds = array<i64: 256, 128>}]} {
    %c0_i32 = arith.constant 0 : i32
    %0 = arith.cmpi eq, %arg2, %c0_i32 : i32
    %1 = arith.extui %0 : i1 to i32
    %c0_i32_0 = arith.constant 0 : i32
    %2 = arith.cmpi ne, %1, %c0_i32_0 : i32
    scf.if %2 {
      %cst_10 = arith.constant 0.000000e+00 : f32
      %12 = vector.broadcast %cst_10 : f32 to vector<256x128xf32>
      %c0_11 = arith.constant 0 : index
      %c0_12 = arith.constant 0 : index
      %13 = vector.load %arg7[%c0_11, %c0_12] : memref<256x128xf32, #tpu.memory_space<vmem>>, vector<256x128xf32>
      tpu.vector_store %arg7[%c0_11, %c0_12], %12 {strides = array<i32>} : memref<256x128xf32, #tpu.memory_space<vmem>>, vector<256x128xf32>,
    } else {
    }
    %c0 = arith.constant 0 : index
    %c0_1 = arith.constant 0 : index
    %3 = vector.load %arg7[%c0, %c0_1] : memref<256x128xf32, #tpu.memory_space<vmem>>, vector<256x128xf32>
    %c0_2 = arith.constant 0 : index
    %c0_3 = arith.constant 0 : index
    %4 = vector.load %arg3[%c0_2, %c0_3] : memref<256x128xbf16, #tpu.memory_space<vmem>>, vector<256x128xbf16>
    %c0_4 = arith.constant 0 : index
    %c0_5 = arith.constant 0 : index
    %5 = vector.load %arg4[%c0_4, %c0_5] : memref<128x128xbf16, #tpu.memory_space<vmem>>, vector<128x128xbf16>
    %cst = arith.constant dense<0.000000e+00> : vector<256x128xf32>
    %6 = tpu.matmul %4, %5, %cst {dimension_numbers = #tpu.dot_dimension_numbers<[1], [0], [0], [1], [0, 0, 1, 1], [], []>} : vector<256x128xbf16>, vector<128x128xbf16>, vector<256x128xf32> -> vector<256x128xf32>
    %7 = arith.addf %3, %6 : vector<256x128xf32>
    %c0_6 = arith.constant 0 : index
    %c0_7 = arith.constant 0 : index
    %8 = vector.load %arg7[%c0_6, %c0_7] : memref<256x128xf32, #tpu.memory_space<vmem>>, vector<256x128xf32>
    tpu.vector_store %arg7[%c0_6, %c0_7], %7 {strides = array<i32>} : memref<256x128xf32, #tpu.memory_space<vmem>>, vector<256x128xf32>,
    %c0_i32_8 = arith.constant 0 : i32
    %9 = arith.cmpi eq, %arg2, %c0_i32_8 : i32
    %10 = arith.extui %9 : i1 to i32
    %c0_i32_9 = arith.constant 0 : i32
    %11 = arith.cmpi ne, %10, %c0_i32_9 : i32
    scf.if %11 {
      %c0_10 = arith.constant 0 : index
      %c0_11 = arith.constant 0 : index
      %12 = vector.load %arg7[%c0_10, %c0_11] : memref<256x128xf32, #tpu.memory_space<vmem>>, vector<256x128xf32>
      %c0_12 = arith.constant 0 : index
      %c0_13 = arith.constant 0 : index
      %13 = vector.load %arg5[%c0_12, %c0_13] : memref<1x128xf32, #tpu.memory_space<vmem>>, vector<1x128xf32>
      %14 = vector.broadcast %13 : vector<1x128xf32> to vector<256x128xf32>
      %15 = arith.addf %12, %14 : vector<256x128xf32>
      %cst_14 = arith.constant 0.000000e+00 : f32
      %16 = vector.broadcast %cst_14 : f32 to vector<256x128xf32>
      %17 = arith.maximumf %15, %16 : vector<256x128xf32>
      %18 = arith.truncf %17 : vector<256x128xf32> to vector<256x128xbf16>
      %c0_15 = arith.constant 0 : index
      %c0_16 = arith.constant 0 : index
      %19 = vector.load %arg6[%c0_15, %c0_16] : memref<256x128xbf16, #tpu.memory_space<vmem>>, vector<256x128xbf16>
      tpu.vector_store %arg6[%c0_15, %c0_16], %18 {strides = array<i32>} : memref<256x128xbf16, #tpu.memory_space<vmem>>, vector<256x128xbf16>,
    } else {
    }
    return
  }
  func.func @transform_0(%arg0: i32, %arg1: i32, %arg2: i32) -> (i32, i32) {
    %c0_i32 = arith.constant 0 : i32
    return %arg0, %arg2 : i32, i32
  }
  func.func @transform_1(%arg0: i32, %arg1: i32, %arg2: i32) -> (i32, i32) {
    %c0_i32 = arith.constant 0 : i32
    return %arg2, %arg1 : i32, i32
  }
  func.func @transform_2(%arg0: i32, %arg1: i32, %arg2: i32) -> (i32, i32) {
    %c0_i32 = arith.constant 0 : i32
    %c0_i32_0 = arith.constant 0 : i32
    return %c0_i32, %arg1 : i32, i32
  }
  func.func @transform_3(%arg0: i32, %arg1: i32, %arg2: i32) -> (i32, i32) {
    %c0_i32 = arith.constant 0 : i32
    return %arg0, %arg1 : i32, i32
  }
}

module attributes {stable_mosaic.version = 11 : i64} {
  func.func @_matmul_bias_act_kernel(%arg0: i32, %arg1: i32, %arg2: i32, %arg3: memref<256x128xbf16, #tpu.memory_space<vmem>>, %arg4: memref<128x128xbf16, #tpu.memory_space<vmem>>, %arg5: memref<1x128xf32, #tpu.memory_space<vmem>>, %arg6: memref<256x128xbf16, #tpu.memory_space<vmem>>, %arg7: memref<256x128xf32, #tpu.memory_space<vmem>>) attributes {dimension_semantics = [#tpu.dimension_semantics<parallel>, #tpu.dimension_semantics<parallel>, #tpu.dimension_semantics<arbitrary>], iteration_bounds = array<i64: 2, 1, 3>, scalar_prefetch = 0 : i64, scratch_operands = 1 : i64, tpu.core_type = #tpu.core_type<tc>, window_params = [{transform_indices = @transform_0, window_bounds = array<i64: 256, 128>}, {transform_indices = @transform_1, window_bounds = array<i64: 128, 128>}, {transform_indices = @transform_2, window_bounds = array<i64: 1, 128>}, {transform_indices = @transform_3, window_bounds = array<i64: 256, 128>}]} {
    %c0_i32 = arith.constant 0 : i32
    %0 = arith.cmpi eq, %arg2, %c0_i32 : i32
    %1 = arith.extui %0 : i1 to i32
    %c0_i32_0 = arith.constant 0 : i32
    %2 = arith.cmpi ne, %1, %c0_i32_0 : i32
    scf.if %2 {
      %cst_9 = arith.constant 0.000000e+00 : f32
      %12 = vector.broadcast %cst_9 : f32 to vector<256x128xf32>
      %c0_10 = arith.constant 0 : index
      %c0_11 = arith.constant 0 : index
      %13 = vector.load %arg7[%c0_10, %c0_11] : memref<256x128xf32, #tpu.memory_space<vmem>>, vector<256x128xf32>
      tpu.vector_store %arg7[%c0_10, %c0_11], %12 {strides = array<i32>} : memref<256x128xf32, #tpu.memory_space<vmem>>, vector<256x128xf32>,
    } else {
    }
    %c0 = arith.constant 0 : index
    %c0_1 = arith.constant 0 : index
    %3 = vector.load %arg7[%c0, %c0_1] : memref<256x128xf32, #tpu.memory_space<vmem>>, vector<256x128xf32>
    %c0_2 = arith.constant 0 : index
    %c0_3 = arith.constant 0 : index
    %4 = vector.load %arg3[%c0_2, %c0_3] : memref<256x128xbf16, #tpu.memory_space<vmem>>, vector<256x128xbf16>
    %c0_4 = arith.constant 0 : index
    %c0_5 = arith.constant 0 : index
    %5 = vector.load %arg4[%c0_4, %c0_5] : memref<128x128xbf16, #tpu.memory_space<vmem>>, vector<128x128xbf16>
    %cst = arith.constant dense<0.000000e+00> : vector<256x128xf32>
    %6 = tpu.matmul %4, %5, %cst {dimension_numbers = #tpu.dot_dimension_numbers<[1], [0], [0], [1], [0, 0, 1, 1], [], []>} : vector<256x128xbf16>, vector<128x128xbf16>, vector<256x128xf32> -> vector<256x128xf32>
    %7 = arith.addf %3, %6 : vector<256x128xf32>
    %c0_6 = arith.constant 0 : index
    %c0_7 = arith.constant 0 : index
    %8 = vector.load %arg7[%c0_6, %c0_7] : memref<256x128xf32, #tpu.memory_space<vmem>>, vector<256x128xf32>
    tpu.vector_store %arg7[%c0_6, %c0_7], %7 {strides = array<i32>} : memref<256x128xf32, #tpu.memory_space<vmem>>, vector<256x128xf32>,
    %c2_i32 = arith.constant 2 : i32
    %9 = arith.cmpi eq, %arg2, %c2_i32 : i32
    %10 = arith.extui %9 : i1 to i32
    %c0_i32_8 = arith.constant 0 : i32
    %11 = arith.cmpi ne, %10, %c0_i32_8 : i32
    scf.if %11 {
      %c0_9 = arith.constant 0 : index
      %c0_10 = arith.constant 0 : index
      %12 = vector.load %arg7[%c0_9, %c0_10] : memref<256x128xf32, #tpu.memory_space<vmem>>, vector<256x128xf32>
      %c0_11 = arith.constant 0 : index
      %c0_12 = arith.constant 0 : index
      %13 = vector.load %arg5[%c0_11, %c0_12] : memref<1x128xf32, #tpu.memory_space<vmem>>, vector<1x128xf32>
      %14 = vector.broadcast %13 : vector<1x128xf32> to vector<256x128xf32>
      %15 = arith.addf %12, %14 : vector<256x128xf32>
      %cst_13 = arith.constant 0.000000e+00 : f32
      %16 = vector.broadcast %cst_13 : f32 to vector<256x128xf32>
      %17 = arith.maximumf %15, %16 : vector<256x128xf32>
      %18 = arith.truncf %17 : vector<256x128xf32> to vector<256x128xbf16>
      %c0_14 = arith.constant 0 : index
      %c0_15 = arith.constant 0 : index
      %19 = vector.load %arg6[%c0_14, %c0_15] : memref<256x128xbf16, #tpu.memory_space<vmem>>, vector<256x128xbf16>
      tpu.vector_store %arg6[%c0_14, %c0_15], %18 {strides = array<i32>} : memref<256x128xbf16, #tpu.memory_space<vmem>>, vector<256x128xbf16>,
    } else {
    }
    return
  }
  func.func @transform_0(%arg0: i32, %arg1: i32, %arg2: i32) -> (i32, i32) {
    %c0_i32 = arith.constant 0 : i32
    return %arg0, %arg2 : i32, i32
  }
  func.func @transform_1(%arg0: i32, %arg1: i32, %arg2: i32) -> (i32, i32) {
    %c0_i32 = arith.constant 0 : i32
    return %arg2, %arg1 : i32, i32
  }
  func.func @transform_2(%arg0: i32, %arg1: i32, %arg2: i32) -> (i32, i32) {
    %c0_i32 = arith.constant 0 : i32
    %c0_i32_0 = arith.constant 0 : i32
    return %c0_i32, %arg1 : i32, i32
  }
  func.func @transform_3(%arg0: i32, %arg1: i32, %arg2: i32) -> (i32, i32) {
    %c0_i32 = arith.constant 0 : i32
    return %arg0, %arg1 : i32, i32
  }
}

module attributes {stable_mosaic.version = 11 : i64} {
  func.func @_matmul_bias_act_kernel(%arg0: i32, %arg1: i32, %arg2: i32, %arg3: memref<256x128xbf16, #tpu.memory_space<vmem>>, %arg4: memref<128x128xbf16, #tpu.memory_space<vmem>>, %arg5: memref<1x128xf32, #tpu.memory_space<vmem>>, %arg6: memref<256x128xf32, #tpu.memory_space<vmem>>, %arg7: memref<256x128xf32, #tpu.memory_space<vmem>>) attributes {dimension_semantics = [#tpu.dimension_semantics<parallel>, #tpu.dimension_semantics<parallel>, #tpu.dimension_semantics<arbitrary>], iteration_bounds = array<i64: 2, 1, 1>, scalar_prefetch = 0 : i64, scratch_operands = 1 : i64, tpu.core_type = #tpu.core_type<tc>, window_params = [{transform_indices = @transform_0, window_bounds = array<i64: 256, 128>}, {transform_indices = @transform_1, window_bounds = array<i64: 128, 128>}, {transform_indices = @transform_2, window_bounds = array<i64: 1, 128>}, {transform_indices = @transform_3, window_bounds = array<i64: 256, 128>}]} {
    %c0_i32 = arith.constant 0 : i32
    %0 = arith.cmpi eq, %arg2, %c0_i32 : i32
    %1 = arith.extui %0 : i1 to i32
    %c0_i32_0 = arith.constant 0 : i32
    %2 = arith.cmpi ne, %1, %c0_i32_0 : i32
    scf.if %2 {
      %cst_10 = arith.constant 0.000000e+00 : f32
      %12 = vector.broadcast %cst_10 : f32 to vector<256x128xf32>
      %c0_11 = arith.constant 0 : index
      %c0_12 = arith.constant 0 : index
      %13 = vector.load %arg7[%c0_11, %c0_12] : memref<256x128xf32, #tpu.memory_space<vmem>>, vector<256x128xf32>
      tpu.vector_store %arg7[%c0_11, %c0_12], %12 {strides = array<i32>} : memref<256x128xf32, #tpu.memory_space<vmem>>, vector<256x128xf32>,
    } else {
    }
    %c0 = arith.constant 0 : index
    %c0_1 = arith.constant 0 : index
    %3 = vector.load %arg7[%c0, %c0_1] : memref<256x128xf32, #tpu.memory_space<vmem>>, vector<256x128xf32>
    %c0_2 = arith.constant 0 : index
    %c0_3 = arith.constant 0 : index
    %4 = vector.load %arg3[%c0_2, %c0_3] : memref<256x128xbf16, #tpu.memory_space<vmem>>, vector<256x128xbf16>
    %c0_4 = arith.constant 0 : index
    %c0_5 = arith.constant 0 : index
    %5 = vector.load %arg4[%c0_4, %c0_5] : memref<128x128xbf16, #tpu.memory_space<vmem>>, vector<128x128xbf16>
    %cst = arith.constant dense<0.000000e+00> : vector<256x128xf32>
    %6 = tpu.matmul %4, %5, %cst {dimension_numbers = #tpu.dot_dimension_numbers<[1], [0], [0], [1], [0, 0, 1, 1], [], []>} : vector<256x128xbf16>, vector<128x128xbf16>, vector<256x128xf32> -> vector<256x128xf32>
    %7 = arith.addf %3, %6 : vector<256x128xf32>
    %c0_6 = arith.constant 0 : index
    %c0_7 = arith.constant 0 : index
    %8 = vector.load %arg7[%c0_6, %c0_7] : memref<256x128xf32, #tpu.memory_space<vmem>>, vector<256x128xf32>
    tpu.vector_store %arg7[%c0_6, %c0_7], %7 {strides = array<i32>} : memref<256x128xf32, #tpu.memory_space<vmem>>, vector<256x128xf32>,
    %c0_i32_8 = arith.constant 0 : i32
    %9 = arith.cmpi eq, %arg2, %c0_i32_8 : i32
    %10 = arith.extui %9 : i1 to i32
    %c0_i32_9 = arith.constant 0 : i32
    %11 = arith.cmpi ne, %10, %c0_i32_9 : i32
    scf.if %11 {
      %c0_10 = arith.constant 0 : index
      %c0_11 = arith.constant 0 : index
      %12 = vector.load %arg7[%c0_10, %c0_11] : memref<256x128xf32, #tpu.memory_space<vmem>>, vector<256x128xf32>
      %c0_12 = arith.constant 0 : index
      %c0_13 = arith.constant 0 : index
      %13 = vector.load %arg5[%c0_12, %c0_13] : memref<1x128xf32, #tpu.memory_space<vmem>>, vector<1x128xf32>
      %14 = vector.broadcast %13 : vector<1x128xf32> to vector<256x128xf32>
      %15 = arith.addf %12, %14 : vector<256x128xf32>
      %c0_14 = arith.constant 0 : index
      %c0_15 = arith.constant 0 : index
      %16 = vector.load %arg6[%c0_14, %c0_15] : memref<256x128xf32, #tpu.memory_space<vmem>>, vector<256x128xf32>
      tpu.vector_store %arg6[%c0_14, %c0_15], %15 {strides = array<i32>} : memref<256x128xf32, #tpu.memory_space<vmem>>, vector<256x128xf32>,
    } else {
    }
    return
  }
  func.func @transform_0(%arg0: i32, %arg1: i32, %arg2: i32) -> (i32, i32) {
    %c0_i32 = arith.constant 0 : i32
    return %arg0, %arg2 : i32, i32
  }
  func.func @transform_1(%arg0: i32, %arg1: i32, %arg2: i32) -> (i32, i32) {
    %c0_i32 = arith.constant 0 : i32
    return %arg2, %arg1 : i32, i32
  }
  func.func @transform_2(%arg0: i32, %arg1: i32, %arg2: i32) -> (i32, i32) {
    %c0_i32 = arith.constant 0 : i32
    %c0_i32_0 = arith.constant 0 : i32
    return %c0_i32, %arg1 : i32, i32
  }
  func.func @transform_3(%arg0: i32, %arg1: i32, %arg2: i32) -> (i32, i32) {
    %c0_i32 = arith.constant 0 : i32
    return %arg0, %arg1 : i32, i32
  }
}

</mosaic_0001>

<bundles_post_ra>
// kernel: fcn_head_forward.4
= control target key start
LH: loop header
LB: loop body
LE: loop exit
PB: predicated region body
PF: predicated region fallthrough
CT: control target
= control target key end

     0   :  { %s1499_s12 = smov 0   ;;  %s1501_s13 = smov 0   ;;  %s1636_s0 = inlined_call_operand.vmem [shape: bf16[512,128], index: 0, kind: input, shape index: {}]   ;;  %s1637_s1 = inlined_call_operand.vmem [shape: bf16[128,128], index: 1, kind: input, shape index: {}]   ;;  %s1638_s2 = inlined_call_operand.vmem [shape: f32[1,128], index: 2, kind: input, shape index: {}]   ;;  %s1639_s3 = inlined_call_operand.vmem [shape: bf16[512,128], index: 3, kind: output, shape index: {}]  }
   0x1   :  { %s1503_s14 = smov 0  }
   0x2 LB: > { %s32_s15 = sadd.s32 1, %s1473_s13  ;;  %p1128_p0 = scmp.ge.s32.totalorder %s1477_s14, 1  ;;  %s1477_s14 = sphi %s1503_s14, %s13_s14   ;;  %s1473_s13 = sphi %s1501_s13, %s1641_s13   ;;  %s1469_s12 = sphi %s1499_s12, %s1640_s12  }
   0x3   : > { %p34_p1 = scmp.ge.s32.totalorder %s32_s15, 2  ;;  %p188_p2 = scmp.lt.s32.totalorder %s1477_s14, 3 }
   0x5   : > { %s1643_s15 = smov (%p34_p1, %s32_s15), 0  ;;  %p189_p3 = pnand %p1128_p0, %p188_p2 }
   0x6   : > { %s1129_s18 = sshll.u32 (!%p189_p3), %s1469_s12, 5 }
   0x7   : > { %192 = sbr.rel (%p189_p3) target bundleno = 275 (0x113), region = 32  ;;  %p230_p4 = scmp.lt.s32.totalorder (!%p189_p3), %s1129_s18, 63 }
   0xc   : > { %v1431_v0 = vld [vmem:[%s1637_s1 + $0x38] sm:$0xff]   ;;  %v1432_v1 = vld [vmem:[%s1637_s1 + $0x30] sm:$0xff]   ;;  %s1645_s18 = smov (!%p230_p4, %s1129_s18), 63  ;;  %v1433_v2 = vld [vmem:[%s1637_s1 + $0x28] sm:$0xff]  }
   0xd   : > { %1343 = vmatprep.subr.bf16.mxu0 %v1431_v0  ;;  %1391 = vmatprep.subr.bf16.mxu1 %v1431_v0  ;;  %s1130_s23 = sshll.u32 %s1645_s18, 2  ;;  %v1434_v3 = vld [vmem:[%s1637_s1 + $0x20] sm:$0xff]   ;;  %v1435_v6 = vld [vmem:[%s1637_s1 + $0x18] sm:$0xff]   ;;  %v1436_v7 = vld [vmem:[%s1637_s1 + $0x10] sm:$0xff]  }
   0xe   : > { %1344 = vmatpush3.bf16.msra.mxu0 %v1431_v0  ;;  %1399 = vmatpush3.bf16.msra.mxu1 %v1431_v0  ;;  %s1534_s26 = scalar_lea.vmem %s1636_s0, %s1130_s23  ;;  %v1437_v8 = vld [vmem:[%s1637_s1 + $0x8] sm:$0xff]   ;;  %v1438_v9 = vld [vmem:[%s1637_s1] sm:$0xff]   ;;  %s1585_s17 = scalar_lea.vmem %s1639_s3, %s1130_s23 }
   0xf   : > { %1345 = vmatprep.subr.bf16.mxu0 %v1432_v1  ;;  %1392 = vmatprep.subr.bf16.mxu1 %v1432_v1  ;;  %v1439_v4 = vld [vmem:[%s1534_s26] sm:$0xff]   ;;  %v1441_v10 = vld [vmem:[%s1534_s26 + $0x8] sm:$0xff]   ;;  %v1443_v12 = vld [vmem:[%s1534_s26 + $0x10] sm:$0xff]  }
  0x10   : > { %v1440_v5 = vld [vmem:[%s1534_s26 + $0x40] sm:$0xff]   ;;  %1359 = vmatprep.mubr.bf16.mxu0 %v1439_v4  ;;  %v1442_v11 = vld [vmem:[%s1534_s26 + $0x48] sm:$0xff]   ;;  %v1444_v13 = vld [vmem:[%s1534_s26 + $0x50] sm:$0xff]  }
  0x11   : > { %1375 = vmatprep.mubr.bf16.mxu1 %v1440_v5  ;;  %v1445_v14 = vld [vmem:[%s1534_s26 + $0x18] sm:$0xff]   ;;  %v1447_v16 = vld [vmem:[%s1534_s26 + $0x20] sm:$0xff]   ;;  %v1449_v18 = vld [vmem:[%s1534_s26 + $0x28] sm:$0xff]  }
  0x12   : > { %1346 = vmatpush3.bf16.msra.mxu0 %v1432_v1  ;;  %1400 = vmatpush3.bf16.msra.mxu1 %v1432_v1  ;;  %v1446_v15 = vld [vmem:[%s1534_s26 + $0x58] sm:$0xff]   ;;  %v1448_v17 = vld [vmem:[%s1534_s26 + $0x60] sm:$0xff]   ;;  %v1450_v19 = vld [vmem:[%s1534_s26 + $0x68] sm:$0xff]  }
  0x13   : > { %1347 = vmatprep.subr.bf16.mxu0 %v1433_v2  ;;  %1393 = vmatprep.subr.bf16.mxu1 %v1433_v2  ;;  %v1451_v20 = vld [vmem:[%s1534_s26 + $0x30] sm:$0xff]   ;;  %v1453_v22 = vld [vmem:[%s1534_s26 + $0x38] sm:$0xff]   ;;  %v1570_v24 = vld [vmem:[%s1638_s2] ss:$0 sm:$0xff] }
  0x14   : > { %v1452_v21 = vld [vmem:[%s1534_s26 + $0x70] sm:$0xff]   ;;  %v1454_v23 = vld [vmem:[%s1534_s26 + $0x78] sm:$0xff]  }
  0x16   : > { %1348 = vmatpush3.bf16.msra.mxu0 %v1433_v2  ;;  %1401 = vmatpush3.bf16.msra.mxu1 %v1433_v2 }
  0x17   : > { %1349 = vmatprep.subr.bf16.mxu0 %v1434_v3  ;;  %1394 = vmatprep.subr.bf16.mxu1 %v1434_v3 }
  0x1a   : > { %1350 = vmatpush3.bf16.msra.mxu0 %v1434_v3  ;;  %1402 = vmatpush3.bf16.msra.mxu1 %v1434_v3 }
  0x1b   : > { %1351 = vmatprep.subr.bf16.mxu0 %v1435_v6  ;;  %1395 = vmatprep.subr.bf16.mxu1 %v1435_v6 }
  0x1e   : > { %1352 = vmatpush3.bf16.msra.mxu0 %v1435_v6  ;;  %1403 = vmatpush3.bf16.msra.mxu1 %v1435_v6 }
  0x1f   : > { %1353 = vmatprep.subr.bf16.mxu0 %v1436_v7  ;;  %1396 = vmatprep.subr.bf16.mxu1 %v1436_v7 }
  0x22   : > { %1354 = vmatpush3.bf16.msra.mxu0 %v1436_v7  ;;  %1404 = vmatpush3.bf16.msra.mxu1 %v1436_v7 }
  0x23   : > { %1355 = vmatprep.subr.bf16.mxu0 %v1437_v8  ;;  %1397 = vmatprep.subr.bf16.mxu1 %v1437_v8 }
  0x26   : > { %1356 = vmatpush3.bf16.msra.mxu0 %v1437_v8  ;;  %1405 = vmatpush3.bf16.msra.mxu1 %v1437_v8 }
  0x27   : > { %1357 = vmatprep.subr.bf16.mxu0 %v1438_v9  ;;  %1398 = vmatprep.subr.bf16.mxu1 %v1438_v9 }
  0x2a   : > { %1358 = vmatpush3.bf16.msra.mxu0 %v1438_v9  ;;  %1406 = vmatpush3.bf16.msra.mxu1 %v1438_v9 }
  0x2d   : > { %1360 = vmatmul.mubr.bf16.vlgmr.msra.gmra.mxu0 %v1441_v10  ;;  %1376 = vmatmul.mubr.bf16.vlgmr.msra.gmra.mxu1 %v1442_v11 }
  0x2e   : > { %1363 = vmatprep.mubr.bf16.mxu0 %v1443_v12  ;;  %1379 = vmatprep.mubr.bf16.mxu1 %v1444_v13 }
  0x35   : > { %1364 = vmatmul.mubr.bf16.gmra.mxu0 %v1445_v14  ;;  %1380 = vmatmul.mubr.bf16.gmra.mxu1 %v1446_v15 }
  0x36   : > { %1367 = vmatprep.mubr.bf16.mxu0 %v1447_v16  ;;  %1383 = vmatprep.mubr.bf16.mxu1 %v1448_v17 }
  0x3d   : > { %1368 = vmatmul.mubr.bf16.gmra.mxu0 %v1449_v18  ;;  %1384 = vmatmul.mubr.bf16.gmra.mxu1 %v1450_v19 }
  0x3e   : > { %1371 = vmatprep.mubr.bf16.mxu0 %v1451_v20  ;;  %1387 = vmatprep.mubr.bf16.mxu1 %v1452_v21 }
  0x45   : > { %1372 = vmatmul.mubr.bf16.gmra.mxu0 %v1453_v22  ;;  %1388 = vmatmul.mubr.bf16.gmra.mxu1 %v1454_v23 }
  0xed   : > { %v1361_v25 = vpop.f32.mrf.mxu0  ;;  %v1377_v26 = vpop.f32.mrf.mxu1 }
  0xee   : > { %v789_v27 = vadd.f32 %v1361_v25, %v1570_v24  ;;  %v805_v28 = vadd.f32 %v1377_v26, %v1570_v24 }
  0xef   : > { %v554_v29 = vpop.f32.mrf.mxu0  ;;  %v618_v30 = vpop.f32.mrf.mxu1 }
  0xf0   : > { %v787_v31 = vadd.f32 %v1570_v24, %v554_v29  ;;  %v803_v32 = vadd.f32 %v1570_v24, %v618_v30  ;;  %v821_v37 = vmax.f32 %v789_v27, 0.0  ;;  %v837_v38 = vmax.f32 %v805_v28, 0.0 }
  0xf1   : > { %v1362_v33 = vpop.f32.mrf.mxu0  ;;  %v1378_v34 = vpop.f32.mrf.mxu1 }
  0xf2   : > { %v790_v35 = vadd.f32 %v1362_v33, %v1570_v24  ;;  %v806_v36 = vadd.f32 %v1378_v34, %v1570_v24  ;;  %v819_v45 = vmax.f32 %v787_v31, 0.0  ;;  %v835_v46 = vmax.f32 %v803_v32, 0.0 }
  0xf3   : > { %v557_v39 = vpop.f32.mrf.mxu0  ;;  %v621_v40 = vpop.f32.mrf.mxu1 }
  0xf4   : > { %v822_v41 = vmax.f32 %v790_v35, 0.0  ;;  %v838_v42 = vmax.f32 %v806_v36, 0.0  ;;  %v788_v43 = vadd.f32 %v1570_v24, %v557_v39  ;;  %v804_v44 = vadd.f32 %v1570_v24, %v621_v40 }
  0xf5   : > { %v1365_v47 = vpop.f32.mrf.mxu0  ;;  %v1381_v48 = vpop.f32.mrf.mxu1 }
  0xf6   : > { %v1232_v49 = vpack.c.bf16 %v822_v41, %v821_v37  ;;  %v1272_v50 = vpack.c.bf16 %v838_v42, %v837_v38  ;;  %v820_v51 = vmax.f32 %v788_v43, 0.0  ;;  %v836_v52 = vmax.f32 %v804_v44, 0.0 }
  0xf7   : > { %v793_v53 = vadd.f32 %v1365_v47, %v1570_v24  ;;  %v809_v54 = vadd.f32 %v1381_v48, %v1570_v24  ;;  %v570_v55 = vpop.f32.mrf.mxu0  ;;  %v634_v56 = vpop.f32.mrf.mxu1 }
  0xf8   : > { %1304 = vst [vmem:[%s1585_s17 + $0x8] sm:$0xff] %v1232_v49   ;;  %1312 = vst [vmem:[%s1585_s17 + $0x48] sm:$0xff] %v1272_v50   ;;  %v1227_v57 = vpack.c.bf16 %v820_v51, %v819_v45  ;;  %v1267_v58 = vpack.c.bf16 %v836_v52, %v835_v46  ;;  %v791_v59 = vadd.f32 %v1570_v24, %v570_v55 }
  0xf9   : > { %v807_v60 = vadd.f32 %v1570_v24, %v634_v56  ;;  %v1366_v61 = vpop.f32.mrf.mxu0  ;;  %v1382_v62 = vpop.f32.mrf.mxu1  ;;  %v825_v1 = vmax.f32 %v793_v53, 0.0  ;;  %v841_v2 = vmax.f32 %v809_v54, 0.0 }
  0xfa   : > { %1228 = vst [vmem:[%s1585_s17] sm:$0xff] %v1227_v57   ;;  %1311 = vst [vmem:[%s1585_s17 + $0x40] sm:$0xff] %v1267_v58   ;;  %v794_v63 = vadd.f32 %v1366_v61, %v1570_v24  ;;  %v810_v0 = vadd.f32 %v1382_v62, %v1570_v24  ;;  %v823_v9 = vmax.f32 %v791_v59, 0.0 }
  0xfb   : > { %v573_v3 = vpop.f32.mrf.mxu0  ;;  %v637_v4 = vpop.f32.mrf.mxu1  ;;  %v839_v10 = vmax.f32 %v807_v60, 0.0 }
  0xfc   : > { %v826_v5 = vmax.f32 %v794_v63, 0.0  ;;  %v842_v6 = vmax.f32 %v810_v0, 0.0  ;;  %v792_v7 = vadd.f32 %v1570_v24, %v573_v3  ;;  %v808_v8 = vadd.f32 %v1570_v24, %v637_v4 }
  0xfd   : > { %v1369_v11 = vpop.f32.mrf.mxu0  ;;  %v1385_v12 = vpop.f32.mrf.mxu1 }
  0xfe   : > { %v1242_v13 = vpack.c.bf16 %v826_v5, %v825_v1  ;;  %v1282_v14 = vpack.c.bf16 %v842_v6, %v841_v2  ;;  %v824_v15 = vmax.f32 %v792_v7, 0.0  ;;  %v840_v16 = vmax.f32 %v808_v8, 0.0 }
  0xff   : > { %v797_v17 = vadd.f32 %v1369_v11, %v1570_v24  ;;  %v813_v18 = vadd.f32 %v1385_v12, %v1570_v24  ;;  %v586_v19 = vpop.f32.mrf.mxu0  ;;  %v650_v20 = vpop.f32.mrf.mxu1 }
 0x100   : > { %1306 = vst [vmem:[%s1585_s17 + $0x18] sm:$0xff] %v1242_v13   ;;  %1314 = vst [vmem:[%s1585_s17 + $0x58] sm:$0xff] %v1282_v14   ;;  %v1237_v21 = vpack.c.bf16 %v824_v15, %v823_v9  ;;  %v1277_v22 = vpack.c.bf16 %v840_v16, %v839_v10  ;;  %v795_v23 = vadd.f32 %v1570_v24, %v586_v19 }
 0x101   : > { %v811_v25 = vadd.f32 %v1570_v24, %v650_v20  ;;  %v1370_v26 = vpop.f32.mrf.mxu0  ;;  %v1386_v27 = vpop.f32.mrf.mxu1  ;;  %v829_v30 = vmax.f32 %v797_v17, 0.0  ;;  %v845_v31 = vmax.f32 %v813_v18, 0.0 }
 0x102   : > { %1305 = vst [vmem:[%s1585_s17 + $0x10] sm:$0xff] %v1237_v21   ;;  %1313 = vst [vmem:[%s1585_s17 + $0x50] sm:$0xff] %v1277_v22   ;;  %v798_v28 = vadd.f32 %v1370_v26, %v1570_v24  ;;  %v814_v29 = vadd.f32 %v1386_v27, %v1570_v24  ;;  %v827_v38 = vmax.f32 %v795_v23, 0.0 }
 0x103   : > { %v589_v32 = vpop.f32.mrf.mxu0  ;;  %v653_v33 = vpop.f32.mrf.mxu1  ;;  %v843_v39 = vmax.f32 %v811_v25, 0.0 }
 0x104   : > { %v830_v34 = vmax.f32 %v798_v28, 0.0  ;;  %v846_v35 = vmax.f32 %v814_v29, 0.0  ;;  %v796_v36 = vadd.f32 %v1570_v24, %v589_v32  ;;  %v812_v37 = vadd.f32 %v1570_v24, %v653_v33 }
 0x105   : > { %v1373_v40 = vpop.f32.mrf.mxu0  ;;  %v1389_v41 = vpop.f32.mrf.mxu1 }
 0x106   : > { %v1252_v42 = vpack.c.bf16 %v830_v34, %v829_v30  ;;  %v1292_v43 = vpack.c.bf16 %v846_v35, %v845_v31  ;;  %v828_v44 = vmax.f32 %v796_v36, 0.0  ;;  %v844_v45 = vmax.f32 %v812_v37, 0.0 }
 0x107   : > { %v801_v46 = vadd.f32 %v1373_v40, %v1570_v24  ;;  %v817_v47 = vadd.f32 %v1389_v41, %v1570_v24  ;;  %v602_v48 = vpop.f32.mrf.mxu0  ;;  %v666_v49 = vpop.f32.mrf.mxu1 }
 0x108   : > { %1308 = vst [vmem:[%s1585_s17 + $0x28] sm:$0xff] %v1252_v42   ;;  %1316 = vst [vmem:[%s1585_s17 + $0x68] sm:$0xff] %v1292_v43   ;;  %v1247_v50 = vpack.c.bf16 %v828_v44, %v827_v38  ;;  %v1287_v51 = vpack.c.bf16 %v844_v45, %v843_v39  ;;  %v799_v52 = vadd.f32 %v1570_v24, %v602_v48 }
 0x109   : > { %v815_v53 = vadd.f32 %v1570_v24, %v666_v49  ;;  %v1374_v54 = vpop.f32.mrf.mxu0  ;;  %v1390_v55 = vpop.f32.mrf.mxu1  ;;  %v833_v58 = vmax.f32 %v801_v46, 0.0  ;;  %v849_v59 = vmax.f32 %v817_v47, 0.0 }
 0x10a   : > { %1307 = vst [vmem:[%s1585_s17 + $0x20] sm:$0xff] %v1247_v50   ;;  %1315 = vst [vmem:[%s1585_s17 + $0x60] sm:$0xff] %v1287_v51   ;;  %v802_v56 = vadd.f32 %v1374_v54, %v1570_v24  ;;  %v818_v57 = vadd.f32 %v1390_v55, %v1570_v24  ;;  %v831_v2 = vmax.f32 %v799_v52, 0.0 }
 0x10b   : > { %v605_v60 = vpop.f32.mrf.mxu0  ;;  %v669_v61 = vpop.f32.mrf.mxu1  ;;  %v847_v3 = vmax.f32 %v815_v53, 0.0 }
 0x10c   : > { %v834_v62 = vmax.f32 %v802_v56, 0.0  ;;  %v850_v63 = vmax.f32 %v818_v57, 0.0  ;;  %v800_v0 = vadd.f32 %v1570_v24, %v605_v60  ;;  %v816_v1 = vadd.f32 %v1570_v24, %v669_v61 }
 0x10e   : > { %v1262_v4 = vpack.c.bf16 %v834_v62, %v833_v58  ;;  %v1302_v5 = vpack.c.bf16 %v850_v63, %v849_v59  ;;  %v832_v6 = vmax.f32 %v800_v0, 0.0  ;;  %v848_v7 = vmax.f32 %v816_v1, 0.0 }
 0x110   : > { %1310 = vst [vmem:[%s1585_s17 + $0x38] sm:$0xff] %v1262_v4   ;;  %1318 = vst [vmem:[%s1585_s17 + $0x78] sm:$0xff] %v1302_v5   ;;  %v1257_v8 = vpack.c.bf16 %v832_v6, %v831_v2  ;;  %v1297_v9 = vpack.c.bf16 %v848_v7, %v847_v3 }
 0x112   : > { %1309 = vst [vmem:[%s1585_s17 + $0x30] sm:$0xff] %v1257_v8   ;;  %1317 = vst [vmem:[%s1585_s17 + $0x70] sm:$0xff] %v1297_v9  }
 0x113 PF: > { %s13_s14 = sadd.s32 1, %s1477_s14   ;;  %s1640_s12 = smov %s1473_s13 }
 0x114   : > { %p10_p5 = scmp.ge.s32.totalorder %s13_s14, 4   ;;  %s1641_s13 = smov %s1643_s15 }
 0x116   :  { %12 = sbr.rel (!%p10_p5) target bundleno = 2 (0x2), region = 76 }

// kernel: fcn_head_forward.5
= control target key start
LH: loop header
LB: loop body
LE: loop exit
PB: predicated region body
PF: predicated region fallthrough
CT: control target
= control target key end

     0   :  { %s1738_s12 = smov 0   ;;  %s1740_s13 = smov 0   ;;  %s1983_s0 = inlined_call_operand.vmem [shape: bf16[512,384], index: 0, kind: input, shape index: {}]   ;;  %s1984_s1 = inlined_call_operand.vmem [shape: bf16[384,128], index: 1, kind: input, shape index: {}]   ;;  %s1985_s2 = inlined_call_operand.vmem [shape: f32[1,128], index: 2, kind: input, shape index: {}]   ;;  %s1986_s3 = inlined_call_operand.vmem [shape: bf16[512,128], index: 3, kind: output, shape index: {}]  }
   0x1   :  { %s1742_s14 = smov 0   ;;  %s1744_s15 = smov 0  }
   0x2   :  { %s1746_s16 = smov 0   ;;  %s1748_s17 = smov 0  }
   0x3   :  { %s1750_s18 = smov 0  }
   0x4 LB: > { %s25_s19 = sadd.s32 1, %s1707_s16  ;;  %s32_s20 = sadd.s32 1, %s1711_s17  ;;  %s1715_s18 = sphi %s1750_s18, %s13_s18   ;;  %s1711_s17 = sphi %s1748_s17, %s1992_s17   ;;  %s1707_s16 = sphi %s1746_s16, %s1991_s16   ;;  %s1703_s15 = sphi %s1744_s15, %s1990_s15   ;;  %s1699_s14 = sphi %s1742_s14, %s1989_s14   ;;  %s1695_s13 = sphi %s1740_s13, %s1988_s13   ;;  %s1691_s12 = sphi %s1738_s12, %s1987_s12  }
   0x5   : > { %p26_p0 = scmp.ge.s32.totalorder %s25_s19, 3  ;;  %p48_p1 = scmp.ne.s32.totalorder %s1695_s13, %s1691_s12 }
   0x6   : > { %p49_p2 = scmp.eq.s32.totalorder %s1715_s18, 0  ;;  %s41_s24 = sadd.s32 1, %s1695_s13 }
   0x7   : > { %s1994_s19 = smov (%p26_p0, %s25_s19), 0  ;;  %s1996_s20 = smov (!%p26_p0, %s32_s20), %s1711_s17 }
   0x8   : > { %p50_p3 = por %p49_p2, %p48_p1  ;;  %p34_p4 = scmp.ge.s32.totalorder %s1996_s20, 2 }
   0x9   : > { %s37_s21 = ssub.s32 %s1707_s16, %s1994_s19  ;;  %p1292_p6 = scmp.ge.s32.totalorder %s1715_s18, 6 }
   0xa   : > { %s1998_s20 = smov (%p34_p4, %s1996_s20), 0 }
   0xb   : > { %s36_s22 = ssub.s32 %s1711_s17, %s1998_s20  ;;  %162 = sbr.rel (%p1292_p6) target bundleno = 44 (0x2c), region = 20 }
   0xc   : > { %s38_s23 = sor.u32 %s37_s21, %s36_s22 }
   0xd   : > { %p39_p5 = scmp.eq.s32.totalorder %s38_s23, 0 }
   0xf   : > { %s1789_s25 = scalar_select %p39_p5, %s1695_s13, %s41_s24  }
  0x10   : > { %165 = sbr.rel (!%p50_p3) target bundleno = 44 (0x2c), region = 24  ;;  %s167_s26 = sand.u32 (%p50_p3), 1, %s1695_s13  }
  0x11   : > { %s1579_s27 = smul.u32 (%p50_p3), 96, %s1711_s17  ;;  %s1293_s28 = sshll.u32 (%p50_p3), %s167_s26, 7 }
  0x12   : > { %s1803_s7 = scalar_lea.vmem (%p50_p3), [#allocation3], %s1293_s28 }
  0x13   : > { %s172_s29 = sadd.s32 (%p50_p3), %s1707_s16, %s1579_s27 }
  0x14   : > { %s1296_s30 = sshll.u32 (%p50_p3), %s172_s29, 2 }
  0x15   : > { %s1798_s6 = scalar_lea.vmem %s1983_s0, %s1296_s30 }
  0x16   : > { %v191_v0 = vld [vmem:[%s1798_s6] sm:$0xf]  ;;  %v193_v1 = vld [vmem:[%s1798_s6 + $0xc] sm:$0xf]  ;;  %v195_v2 = vld [vmem:[%s1798_s6 + $0x18] sm:$0xf] }
  0x17   : > { %192 = vst [vmem:[%s1803_s7] sm:$0xf] %v191_v0  ;;  %194 = vst [vmem:[%s1803_s7 + $0x4] sm:$0xf] %v193_v1  ;;  %v197_v3 = vld [vmem:[%s1798_s6 + $0x24] sm:$0xf] }
  0x18   : > { %196 = vst [vmem:[%s1803_s7 + $0x8] sm:$0xf] %v195_v2  ;;  %v199_v4 = vld [vmem:[%s1798_s6 + $0x30] sm:$0xf]  ;;  %v201_v5 = vld [vmem:[%s1798_s6 + $0x3c] sm:$0xf] }
  0x19   : > { %198 = vst [vmem:[%s1803_s7 + $0xc] sm:$0xf] %v197_v3  ;;  %200 = vst [vmem:[%s1803_s7 + $0x10] sm:$0xf] %v199_v4  ;;  %v203_v6 = vld [vmem:[%s1798_s6 + $0x48] sm:$0xf] }
  0x1a   : > { %202 = vst [vmem:[%s1803_s7 + $0x14] sm:$0xf] %v201_v5  ;;  %v205_v7 = vld [vmem:[%s1798_s6 + $0x54] sm:$0xf]  ;;  %v207_v8 = vld [vmem:[%s1798_s6 + $0x60] sm:$0xf] }
  0x1b   : > { %204 = vst [vmem:[%s1803_s7 + $0x18] sm:$0xf] %v203_v6  ;;  %206 = vst [vmem:[%s1803_s7 + $0x1c] sm:$0xf] %v205_v7  ;;  %v209_v9 = vld [vmem:[%s1798_s6 + $0x6c] sm:$0xf] }
  0x1c   : > { %208 = vst [vmem:[%s1803_s7 + $0x20] sm:$0xf] %v207_v8  ;;  %v211_v10 = vld [vmem:[%s1798_s6 + $0x78] sm:$0xf]  ;;  %v213_v11 = vld [vmem:[%s1798_s6 + $0x84] sm:$0xf] }
  0x1d   : > { %210 = vst [vmem:[%s1803_s7 + $0x24] sm:$0xf] %v209_v9  ;;  %212 = vst [vmem:[%s1803_s7 + $0x28] sm:$0xf] %v211_v10  ;;  %v215_v12 = vld [vmem:[%s1798_s6 + $0x90] sm:$0xf] }
  0x1e   : > { %214 = vst [vmem:[%s1803_s7 + $0x2c] sm:$0xf] %v213_v11  ;;  %v217_v13 = vld [vmem:[%s1798_s6 + $0x9c] sm:$0xf]  ;;  %v219_v14 = vld [vmem:[%s1798_s6 + $0xa8] sm:$0xf] }
  0x1f   : > { %216 = vst [vmem:[%s1803_s7 + $0x30] sm:$0xf] %v215_v12  ;;  %218 = vst [vmem:[%s1803_s7 + $0x34] sm:$0xf] %v217_v13  ;;  %v221_v15 = vld [vmem:[%s1798_s6 + $0xb4] sm:$0xf] }
  0x20   : > { %220 = vst [vmem:[%s1803_s7 + $0x38] sm:$0xf] %v219_v14  ;;  %v223_v16 = vld [vmem:[%s1798_s6 + $0xc0] sm:$0xf]  ;;  %v225_v17 = vld [vmem:[%s1798_s6 + $0xcc] sm:$0xf] }
  0x21   : > { %222 = vst [vmem:[%s1803_s7 + $0x3c] sm:$0xf] %v221_v15  ;;  %224 = vst [vmem:[%s1803_s7 + $0x40] sm:$0xf] %v223_v16  ;;  %v227_v18 = vld [vmem:[%s1798_s6 + $0xd8] sm:$0xf] }
  0x22   : > { %226 = vst [vmem:[%s1803_s7 + $0x44] sm:$0xf] %v225_v17  ;;  %v229_v19 = vld [vmem:[%s1798_s6 + $0xe4] sm:$0xf]  ;;  %v231_v20 = vld [vmem:[%s1798_s6 + $0xf0] sm:$0xf] }
  0x23   : > { %228 = vst [vmem:[%s1803_s7 + $0x48] sm:$0xf] %v227_v18  ;;  %230 = vst [vmem:[%s1803_s7 + $0x4c] sm:$0xf] %v229_v19  ;;  %v233_v21 = vld [vmem:[%s1798_s6 + $0xfc] sm:$0xf] }
  0x24   : > { %232 = vst [vmem:[%s1803_s7 + $0x50] sm:$0xf] %v231_v20  ;;  %v235_v22 = vld [vmem:[%s1798_s6 + $0x108] sm:$0xf]  ;;  %v237_v23 = vld [vmem:[%s1798_s6 + $0x114] sm:$0xf] }
  0x25   : > { %234 = vst [vmem:[%s1803_s7 + $0x54] sm:$0xf] %v233_v21  ;;  %236 = vst [vmem:[%s1803_s7 + $0x58] sm:$0xf] %v235_v22  ;;  %v239_v24 = vld [vmem:[%s1798_s6 + $0x120] sm:$0xf] }
  0x26   : > { %238 = vst [vmem:[%s1803_s7 + $0x5c] sm:$0xf] %v237_v23  ;;  %v241_v25 = vld [vmem:[%s1798_s6 + $0x12c] sm:$0xf]  ;;  %v243_v26 = vld [vmem:[%s1798_s6 + $0x138] sm:$0xf] }
  0x27   : > { %240 = vst [vmem:[%s1803_s7 + $0x60] sm:$0xf] %v239_v24  ;;  %242 = vst [vmem:[%s1803_s7 + $0x64] sm:$0xf] %v241_v25  ;;  %v245_v27 = vld [vmem:[%s1798_s6 + $0x144] sm:$0xf] }
  0x28   : > { %244 = vst [vmem:[%s1803_s7 + $0x68] sm:$0xf] %v243_v26  ;;  %v247_v28 = vld [vmem:[%s1798_s6 + $0x150] sm:$0xf]  ;;  %v249_v29 = vld [vmem:[%s1798_s6 + $0x15c] sm:$0xf] }
  0x29   : > { %246 = vst [vmem:[%s1803_s7 + $0x6c] sm:$0xf] %v245_v27  ;;  %248 = vst [vmem:[%s1803_s7 + $0x70] sm:$0xf] %v247_v28  ;;  %v251_v30 = vld [vmem:[%s1798_s6 + $0x168] sm:$0xf] }
  0x2a   : > { %250 = vst [vmem:[%s1803_s7 + $0x74] sm:$0xf] %v249_v29  ;;  %v253_v31 = vld [vmem:[%s1798_s6 + $0x174] sm:$0xf]  ;;  %252 = vst [vmem:[%s1803_s7 + $0x78] sm:$0xf] %v251_v30 }
  0x2b   : > { %254 = vst [vmem:[%s1803_s7 + $0x7c] sm:$0xf] %v253_v31 }
  0x2c PF: > { %p1297_p7 = scmp.ge.s32.totalorder %s1715_s18, 1  ;;  %p353_p8 = scmp.lt.s32.totalorder %s1715_s18, 7 }
  0x2e   : > { %p354_p9 = pnand %p1297_p7, %p353_p8 }
  0x2f   : > { %s360_s8 = sand.u32 (!%p354_p9), 1, %s1691_s12   ;;  %s1299_s9 = sshll.u32 (!%p354_p9), %s1699_s14, 4 }
  0x30   : > { %357 = sbr.rel (%p354_p9) target bundleno = 363 (0x16b), region = 69  ;;  %s1298_s10 = sshll.u32 (!%p354_p9), %s360_s8, 7 }
  0x31   : > { %p399_p10 = scmp.lt.s32.totalorder (!%p354_p9), %s1299_s9, 47  ;;  %s1301_s11 = sshll.u32 (!%p354_p9), %s1703_s15, 5 }
  0x32   : > { %p411_p11 = scmp.lt.s32.totalorder (!%p354_p9), %s1301_s11, 63  ;;  %s1881_s12 = scalar_lea.vmem (!%p354_p9), [#allocation3], %s1298_s10 }
  0x33   : > { %p1303_p12 = scmp.ne.s32.totalorder (!%p354_p9), %s1699_s14, 0 }
  0x35   : > { %s2000_s9 = smov (!%p399_p10, %s1299_s9), 47  ;;  %s2002_s11 = smov (!%p411_p11, %s1301_s11), 63 }
  0x36   : > { %s1300_s21 = sshll.u32 %s2000_s9, 2  ;;  %s1302_s26 = sshll.u32 %s2002_s11, 2 }
  0x37   : > { %s1874_s24 = scalar_lea.vmem %s1984_s1, %s1300_s21  ;;  %s1879_s29 = scalar_lea.vmem %s1986_s3, %s1302_s26 }
  0x38   : > { %423 = sbr.rel (%p1303_p12) target bundleno = 78 (0x4e), region = 77 }
  0x3d   : > { %v1717_v32 = vmov 0.0  }
  0x3e   : > { %424 = vst [vmem:[#allocation2 + $0xb0] sm:$0xff] %v1717_v32  ;;  %425 = vst [vmem:[#allocation2] sm:$0xff] %v1717_v32 }
  0x3f   : > { %426 = vst [vmem:[#allocation2 + $0xd8] sm:$0xff] %v1717_v32  ;;  %427 = vst [vmem:[#allocation2 + $0x18] sm:$0xff] %v1717_v32 }
  0x40   : > { %428 = vst [vmem:[#allocation2 + $0x50] sm:$0xff] %v1717_v32  ;;  %429 = vst [vmem:[#allocation2 + $0x68] sm:$0xff] %v1717_v32 }
  0x41   : > { %430 = vst [vmem:[#allocation2 + $0x30] sm:$0xff] %v1717_v32  ;;  %431 = vst [vmem:[#allocation2 + $0x48] sm:$0xff] %v1717_v32 }
  0x42   : > { %432 = vst [vmem:[#allocation2 + $0x80] sm:$0xff] %v1717_v32  ;;  %433 = vst [vmem:[#allocation2 + $0x88] sm:$0xff] %v1717_v32 }
  0x43   : > { %434 = vst [vmem:[#allocation2 + $0xe8] sm:$0xff] %v1717_v32  ;;  %435 = vst [vmem:[#allocation2 + $0xb8] sm:$0xff] %v1717_v32 }
  0x44   : > { %436 = vst [vmem:[#allocation2 + $0x60] sm:$0xff] %v1717_v32  ;;  %437 = vst [vmem:[#allocation2 + $0xf0] sm:$0xff] %v1717_v32 }
  0x45   : > { %438 = vst [vmem:[#allocation2 + $0x8] sm:$0xff] %v1717_v32  ;;  %439 = vst [vmem:[#allocation2 + $0x78] sm:$0xff] %v1717_v32 }
  0x46   : > { %440 = vst [vmem:[#allocation2 + $0x38] sm:$0xff] %v1717_v32  ;;  %441 = vst [vmem:[#allocation2 + $0x58] sm:$0xff] %v1717_v32 }
  0x47   : > { %442 = vst [vmem:[#allocation2 + $0x40] sm:$0xff] %v1717_v32  ;;  %443 = vst [vmem:[#allocation2 + $0xc8] sm:$0xff] %v1717_v32 }
  0x48   : > { %444 = vst [vmem:[#allocation2 + $0xe0] sm:$0xff] %v1717_v32  ;;  %445 = vst [vmem:[#allocation2 + $0x90] sm:$0xff] %v1717_v32 }
  0x49   : > { %446 = vst [vmem:[#allocation2 + $0x70] sm:$0xff] %v1717_v32  ;;  %447 = vst [vmem:[#allocation2 + $0xc0] sm:$0xff] %v1717_v32 }
  0x4a   : > { %448 = vst [vmem:[#allocation2 + $0xa8] sm:$0xff] %v1717_v32  ;;  %449 = vst [vmem:[#allocation2 + $0xd0] sm:$0xff] %v1717_v32 }
  0x4b   : > { %450 = vst [vmem:[#allocation2 + $0x10] sm:$0xff] %v1717_v32  ;;  %451 = vst [vmem:[#allocation2 + $0x28] sm:$0xff] %v1717_v32 }
  0x4c   : > { %452 = vst [vmem:[#allocation2 + $0xa0] sm:$0xff] %v1717_v32  ;;  %453 = vst [vmem:[#allocation2 + $0xf8] sm:$0xff] %v1717_v32 }
  0x4d   : > { %454 = vst [vmem:[#allocation2 + $0x20] sm:$0xff] %v1717_v32  ;;  %455 = vst [vmem:[#allocation2 + $0x98] sm:$0xff] %v1717_v32 }
  0x4e PF: > { %v1637_v33 = vld [vmem:[%s1874_s24 + $0x38] sm:$0xff]   ;;  %v1638_v34 = vld [vmem:[%s1874_s24 + $0x30] sm:$0xff]   ;;  %v1639_v35 = vld [vmem:[%s1874_s24 + $0x28] sm:$0xff]   ;;  %p1328_p13 = scmp.ne.s32.totalorder %s1699_s14, 2 }
  0x4f   : > { %1515 = vmatprep.subr.bf16.mxu0 %v1637_v33  ;;  %1563 = vmatprep.subr.bf16.mxu1 %v1637_v33  ;;  %v1640_v36 = vld [vmem:[%s1874_s24 + $0x20] sm:$0xff]   ;;  %v1641_v39 = vld [vmem:[%s1874_s24 + $0x18] sm:$0xff]   ;;  %v1642_v40 = vld [vmem:[%s1874_s24 + $0x10] sm:$0xff]  }
  0x50   : > { %1516 = vmatpush3.bf16.msra.mxu0 %v1637_v33  ;;  %1571 = vmatpush3.bf16.msra.mxu1 %v1637_v33  ;;  %v1645_v37 = vld [vmem:[%s1881_s12] sm:$0xff]   ;;  %v1643_v41 = vld [vmem:[%s1874_s24 + $0x8] sm:$0xff]   ;;  %v1649_v45 = vld [vmem:[%s1881_s12 + $0x10] sm:$0xff]  }
  0x51   : > { %1517 = vmatprep.subr.bf16.mxu0 %v1638_v34  ;;  %1564 = vmatprep.subr.bf16.mxu1 %v1638_v34  ;;  %v1646_v38 = vld [vmem:[%s1881_s12 + $0x40] sm:$0xff]   ;;  %v1647_v43 = vld [vmem:[%s1881_s12 + $0x8] sm:$0xff]   ;;  %v1650_v46 = vld [vmem:[%s1881_s12 + $0x50] sm:$0xff]  }
  0x52   : > { %1531 = vmatprep.mubr.bf16.mxu0 %v1645_v37  ;;  %1547 = vmatprep.mubr.bf16.mxu1 %v1646_v38  ;;  %v1644_v42 = vld [vmem:[%s1874_s24] sm:$0xff]   ;;  %v1648_v44 = vld [vmem:[%s1881_s12 + $0x48] sm:$0xff]   ;;  %v1651_v47 = vld [vmem:[%s1881_s12 + $0x18] sm:$0xff]  }
  0x53   : > { %v1652_v48 = vld [vmem:[%s1881_s12 + $0x58] sm:$0xff]   ;;  %v1653_v49 = vld [vmem:[%s1881_s12 + $0x20] sm:$0xff]   ;;  %v1655_v51 = vld [vmem:[%s1881_s12 + $0x28] sm:$0xff]  }
  0x54   : > { %1518 = vmatpush3.bf16.msra.mxu0 %v1638_v34  ;;  %1572 = vmatpush3.bf16.msra.mxu1 %v1638_v34  ;;  %v1654_v50 = vld [vmem:[%s1881_s12 + $0x60] sm:$0xff]   ;;  %v1656_v52 = vld [vmem:[%s1881_s12 + $0x68] sm:$0xff]   ;;  %v1657_v53 = vld [vmem:[%s1881_s12 + $0x30] sm:$0xff]  }
  0x55   : > { %1519 = vmatprep.subr.bf16.mxu0 %v1639_v35  ;;  %1565 = vmatprep.subr.bf16.mxu1 %v1639_v35  ;;  %v1658_v54 = vld [vmem:[%s1881_s12 + $0x70] sm:$0xff]   ;;  %v1659_v55 = vld [vmem:[%s1881_s12 + $0x38] sm:$0xff]   ;;  %v474_v58 = vld [vmem:[#allocation2 + $0x40] sm:$0xff] }
  0x56   : > { %v1660_v56 = vld [vmem:[%s1881_s12 + $0x78] sm:$0xff]   ;;  %v456_v61 = vld [vmem:[#allocation2 + $0xb0] sm:$0xff]  ;;  %v475_v4 = vld [vmem:[#allocation2 + $0xc8] sm:$0xff] }
  0x57   : > { %v458_v57 = vld [vmem:[#allocation2 + $0xd8] sm:$0xff]  ;;  %v457_v9 = vld [vmem:[#allocation2] sm:$0xff]  ;;  %v462_v15 = vld [vmem:[#allocation2 + $0x30] sm:$0xff] }
  0x58   : > { %1520 = vmatpush3.bf16.msra.mxu0 %v1639_v35  ;;  %1573 = vmatpush3.bf16.msra.mxu1 %v1639_v35  ;;  %v472_v62 = vld [vmem:[#allocation2 + $0x38] sm:$0xff]  ;;  %v478_v16 = vld [vmem:[#allocation2 + $0x70] sm:$0xff]  ;;  %v476_v22 = vld [vmem:[#allocation2 + $0xe0] sm:$0xff] }
  0x59   : > { %1521 = vmatprep.subr.bf16.mxu0 %v1640_v36  ;;  %1566 = vmatprep.subr.bf16.mxu1 %v1640_v36  ;;  %v459_v3 = vld [vmem:[#allocation2 + $0x18] sm:$0xff]  ;;  %v460_v21 = vld [vmem:[#allocation2 + $0x50] sm:$0xff]  ;;  %v463_v27 = vld [vmem:[#allocation2 + $0x48] sm:$0xff] }
  0x5a   : > { %v473_v10 = vld [vmem:[#allocation2 + $0x58] sm:$0xff]  ;;  %v479_v28 = vld [vmem:[#allocation2 + $0xc0] sm:$0xff]  ;;  %v461_v33 = vld [vmem:[#allocation2 + $0x68] sm:$0xff] }
  0x5b   : > { %v477_v34 = vld [vmem:[#allocation2 + $0x90] sm:$0xff] }
  0x5c   : > { %1522 = vmatpush3.bf16.msra.mxu0 %v1640_v36  ;;  %1574 = vmatpush3.bf16.msra.mxu1 %v1640_v36 }
  0x5d   : > { %1523 = vmatprep.subr.bf16.mxu0 %v1641_v39  ;;  %1567 = vmatprep.subr.bf16.mxu1 %v1641_v39 }
  0x60   : > { %1524 = vmatpush3.bf16.msra.mxu0 %v1641_v39  ;;  %1575 = vmatpush3.bf16.msra.mxu1 %v1641_v39  ;;  %v466_v39 = vld [vmem:[#allocation2 + $0xe8] sm:$0xff] }
  0x61   : > { %1525 = vmatprep.subr.bf16.mxu0 %v1642_v40  ;;  %1568 = vmatprep.subr.bf16.mxu1 %v1642_v40 }
  0x64   : > { %1526 = vmatpush3.bf16.msra.mxu0 %v1642_v40  ;;  %1576 = vmatpush3.bf16.msra.mxu1 %v1642_v40  ;;  %v482_v40 = vld [vmem:[#allocation2 + $0x10] sm:$0xff] }
  0x65   : > { %1527 = vmatprep.subr.bf16.mxu0 %v1643_v41  ;;  %1569 = vmatprep.subr.bf16.mxu1 %v1643_v41 }
  0x68   : > { %1528 = vmatpush3.bf16.msra.mxu0 %v1643_v41  ;;  %1577 = vmatpush3.bf16.msra.mxu1 %v1643_v41 }
  0x69   : > { %1529 = vmatprep.subr.bf16.mxu0 %v1644_v42  ;;  %1570 = vmatprep.subr.bf16.mxu1 %v1644_v42 }
  0x6c   : > { %1530 = vmatpush3.bf16.msra.mxu0 %v1644_v42  ;;  %1578 = vmatpush3.bf16.msra.mxu1 %v1644_v42 }
  0x6f   : > { %1532 = vmatmul.mubr.bf16.vlgmr.msra.gmra.mxu0 %v1647_v43  ;;  %1548 = vmatmul.mubr.bf16.vlgmr.msra.gmra.mxu1 %v1648_v44 }
  0x70   : > { %1535 = vmatprep.mubr.bf16.mxu0 %v1649_v45  ;;  %1551 = vmatprep.mubr.bf16.mxu1 %v1650_v46  ;;  %v464_v45 = vld [vmem:[#allocation2 + $0x80] sm:$0xff]  ;;  %v480_v46 = vld [vmem:[#allocation2 + $0xa8] sm:$0xff] }
  0x77   : > { %1536 = vmatmul.mubr.bf16.gmra.mxu0 %v1651_v47  ;;  %1552 = vmatmul.mubr.bf16.gmra.mxu1 %v1652_v48 }
  0x78   : > { %1539 = vmatprep.mubr.bf16.mxu0 %v1653_v49  ;;  %1555 = vmatprep.mubr.bf16.mxu1 %v1654_v50 }
  0x7f   : > { %1540 = vmatmul.mubr.bf16.gmra.mxu0 %v1655_v51  ;;  %1556 = vmatmul.mubr.bf16.gmra.mxu1 %v1656_v52  ;;  %v467_v51 = vld [vmem:[#allocation2 + $0xb8] sm:$0xff]  ;;  %v483_v52 = vld [vmem:[#allocation2 + $0x28] sm:$0xff] }
  0x80   : > { %1543 = vmatprep.mubr.bf16.mxu0 %v1657_v53  ;;  %1559 = vmatprep.mubr.bf16.mxu1 %v1658_v54 }
  0x87   : > { %1544 = vmatmul.mubr.bf16.gmra.mxu0 %v1659_v55  ;;  %1560 = vmatmul.mubr.bf16.gmra.mxu1 %v1660_v56 }
 0x12f   : > { %v1533_v59 = vpop.f32.mrf.mxu0  ;;  %v1549_v60 = vpop.f32.mrf.mxu1 }
 0x130   : > { %v843_v63 = vadd.f32 %v1533_v59, %v458_v57  ;;  %v859_v0 = vadd.f32 %v1549_v60, %v474_v58  ;;  %v465_v57 = vld [vmem:[#allocation2 + $0x88] sm:$0xff]  ;;  %v481_v58 = vld [vmem:[#allocation2 + $0xd0] sm:$0xff] }
 0x131   : > { %v714_v1 = vpop.f32.mrf.mxu0  ;;  %v778_v2 = vpop.f32.mrf.mxu1 }
 0x132   : > { %875 = vst [vmem:[#allocation2 + $0xd8] sm:$0xff] %v843_v63  ;;  %891 = vst [vmem:[#allocation2 + $0x40] sm:$0xff] %v859_v0  ;;  %v841_v5 = vadd.f32 %v714_v1, %v456_v61  ;;  %v857_v6 = vadd.f32 %v778_v2, %v472_v62  ;;  %v470_v63 = vld [vmem:[#allocation2 + $0x8] sm:$0xff]  ;;  %v486_v0 = vld [vmem:[#allocation2 + $0x20] sm:$0xff] }
 0x133   : > { %v1534_v7 = vpop.f32.mrf.mxu0  ;;  %v1550_v8 = vpop.f32.mrf.mxu1 }
 0x134   : > { %873 = vst [vmem:[#allocation2 + $0xb0] sm:$0xff] %v841_v5  ;;  %889 = vst [vmem:[#allocation2 + $0x38] sm:$0xff] %v857_v6  ;;  %v844_v11 = vadd.f32 %v1534_v7, %v459_v3  ;;  %v860_v12 = vadd.f32 %v1550_v8, %v475_v4  ;;  %v468_v5 = vld [vmem:[#allocation2 + $0x60] sm:$0xff] }
 0x135   : > { %v717_v13 = vpop.f32.mrf.mxu0  ;;  %v781_v14 = vpop.f32.mrf.mxu1  ;;  %v484_v6 = vld [vmem:[#allocation2 + $0xa0] sm:$0xff] }
 0x136   : > { %876 = vst [vmem:[#allocation2 + $0x18] sm:$0xff] %v844_v11  ;;  %892 = vst [vmem:[#allocation2 + $0xc8] sm:$0xff] %v860_v12  ;;  %v842_v17 = vadd.f32 %v717_v13, %v457_v9  ;;  %v858_v18 = vadd.f32 %v781_v14, %v473_v10  ;;  %v471_v11 = vld [vmem:[#allocation2 + $0x78] sm:$0xff] }
 0x137   : > { %v1537_v19 = vpop.f32.mrf.mxu0  ;;  %v1553_v20 = vpop.f32.mrf.mxu1  ;;  %v487_v12 = vld [vmem:[#allocation2 + $0x98] sm:$0xff] }
 0x138   : > { %874 = vst [vmem:[#allocation2] sm:$0xff] %v842_v17  ;;  %890 = vst [vmem:[#allocation2 + $0x58] sm:$0xff] %v858_v18  ;;  %v847_v23 = vadd.f32 %v1537_v19, %v462_v15  ;;  %v863_v24 = vadd.f32 %v1553_v20, %v478_v16  ;;  %v469_v17 = vld [vmem:[#allocation2 + $0xf0] sm:$0xff]  ;;  %v485_v18 = vld [vmem:[#allocation2 + $0xf8] sm:$0xff] }
 0x139   : > { %v730_v25 = vpop.f32.mrf.mxu0  ;;  %v794_v26 = vpop.f32.mrf.mxu1 }
 0x13a   : > { %879 = vst [vmem:[#allocation2 + $0x30] sm:$0xff] %v847_v23  ;;  %895 = vst [vmem:[#allocation2 + $0x70] sm:$0xff] %v863_v24  ;;  %v845_v29 = vadd.f32 %v730_v25, %v460_v21  ;;  %v861_v30 = vadd.f32 %v794_v26, %v476_v22 }
 0x13b   : > { %v1538_v31 = vpop.f32.mrf.mxu0  ;;  %v1554_v32 = vpop.f32.mrf.mxu1 }
 0x13c   : > { %877 = vst [vmem:[#allocation2 + $0x50] sm:$0xff] %v845_v29  ;;  %893 = vst [vmem:[#allocation2 + $0xe0] sm:$0xff] %v861_v30  ;;  %v848_v35 = vadd.f32 %v1538_v31, %v463_v27  ;;  %v864_v36 = vadd.f32 %v1554_v32, %v479_v28 }
 0x13d   : > { %v733_v37 = vpop.f32.mrf.mxu0  ;;  %v797_v38 = vpop.f32.mrf.mxu1 }
 0x13e   : > { %880 = vst [vmem:[#allocation2 + $0x48] sm:$0xff] %v848_v35  ;;  %896 = vst [vmem:[#allocation2 + $0xc0] sm:$0xff] %v864_v36  ;;  %v846_v41 = vadd.f32 %v733_v37, %v461_v33  ;;  %v862_v42 = vadd.f32 %v797_v38, %v477_v34 }
 0x13f   : > { %v1541_v43 = vpop.f32.mrf.mxu0  ;;  %v1557_v44 = vpop.f32.mrf.mxu1 }
 0x140   : > { %878 = vst [vmem:[#allocation2 + $0x68] sm:$0xff] %v846_v41  ;;  %894 = vst [vmem:[#allocation2 + $0x90] sm:$0xff] %v862_v42  ;;  %v851_v47 = vadd.f32 %v1541_v43, %v466_v39  ;;  %v867_v48 = vadd.f32 %v1557_v44, %v482_v40 }
 0x141   : > { %v746_v49 = vpop.f32.mrf.mxu0  ;;  %v810_v50 = vpop.f32.mrf.mxu1 }
 0x142   : > { %883 = vst [vmem:[#allocation2 + $0xe8] sm:$0xff] %v851_v47  ;;  %899 = vst [vmem:[#allocation2 + $0x10] sm:$0xff] %v867_v48  ;;  %v849_v53 = vadd.f32 %v746_v49, %v464_v45  ;;  %v865_v54 = vadd.f32 %v810_v50, %v480_v46 }
 0x143   : > { %v1542_v55 = vpop.f32.mrf.mxu0  ;;  %v1558_v56 = vpop.f32.mrf.mxu1 }
 0x144   : > { %881 = vst [vmem:[#allocation2 + $0x80] sm:$0xff] %v849_v53  ;;  %897 = vst [vmem:[#allocation2 + $0xa8] sm:$0xff] %v865_v54  ;;  %v852_v59 = vadd.f32 %v1542_v55, %v467_v51  ;;  %v868_v60 = vadd.f32 %v1558_v56, %v483_v52 }
 0x145   : > { %v749_v61 = vpop.f32.mrf.mxu0  ;;  %v813_v62 = vpop.f32.mrf.mxu1 }
 0x146   : > { %884 = vst [vmem:[#allocation2 + $0xb8] sm:$0xff] %v852_v59  ;;  %900 = vst [vmem:[#allocation2 + $0x28] sm:$0xff] %v868_v60  ;;  %v850_v1 = vadd.f32 %v749_v61, %v465_v57  ;;  %v866_v2 = vadd.f32 %v813_v62, %v481_v58 }
 0x147   : > { %v1545_v3 = vpop.f32.mrf.mxu0  ;;  %v1561_v4 = vpop.f32.mrf.mxu1 }
 0x148   : > { %882 = vst [vmem:[#allocation2 + $0x88] sm:$0xff] %v850_v1  ;;  %898 = vst [vmem:[#allocation2 + $0xd0] sm:$0xff] %v866_v2  ;;  %v855_v7 = vadd.f32 %v1545_v3, %v470_v63  ;;  %v871_v8 = vadd.f32 %v1561_v4, %v486_v0 }
 0x149   : > { %v762_v9 = vpop.f32.mrf.mxu0  ;;  %v826_v10 = vpop.f32.mrf.mxu1 }
 0x14a   : > { %887 = vst [vmem:[#allocation2 + $0x8] sm:$0xff] %v855_v7  ;;  %903 = vst [vmem:[#allocation2 + $0x20] sm:$0xff] %v871_v8  ;;  %v853_v13 = vadd.f32 %v762_v9, %v468_v5  ;;  %v869_v14 = vadd.f32 %v826_v10, %v484_v6 }
 0x14b   : > { %v1546_v15 = vpop.f32.mrf.mxu0  ;;  %v1562_v16 = vpop.f32.mrf.mxu1 }
 0x14c   : > { %885 = vst [vmem:[#allocation2 + $0x60] sm:$0xff] %v853_v13  ;;  %901 = vst [vmem:[#allocation2 + $0xa0] sm:$0xff] %v869_v14  ;;  %v856_v19 = vadd.f32 %v1546_v15, %v471_v11  ;;  %v872_v20 = vadd.f32 %v1562_v16, %v487_v12  ;;  %908 = sbr.rel (%p1328_p13) target bundleno = 363 (0x16b), region = 81 }
 0x14d   : > { %v765_v21 = vpop.f32.mrf.mxu0  ;;  %v829_v22 = vpop.f32.mrf.mxu1 }
 0x14e   : > { %888 = vst [vmem:[#allocation2 + $0x78] sm:$0xff] %v856_v19  ;;  %904 = vst [vmem:[#allocation2 + $0x98] sm:$0xff] %v872_v20  ;;  %v854_v23 = vadd.f32 %v765_v21, %v469_v17  ;;  %v870_v24 = vadd.f32 %v829_v22, %v485_v18 }
 0x150   : > { %886 = vst [vmem:[#allocation2 + $0xf0] sm:$0xff] %v854_v23  ;;  %902 = vst [vmem:[#allocation2 + $0xf8] sm:$0xff] %v870_v24 }
 0x151   : > { %v909_v25 = vld [vmem:[#allocation2 + $0xb0] sm:$0xff]  ;;  %v910_v26 = vld [vmem:[#allocation2] sm:$0xff]  ;;  %v911_v30 = vld [vmem:[#allocation2 + $0xd8] sm:$0xff] }
 0x152   : > { %v1912_v27 = vld [vmem:[%s1985_s2] ss:$0 sm:$0xff]  ;;  %v912_v31 = vld [vmem:[#allocation2 + $0x18] sm:$0xff]  ;;  %v913_v32 = vld [vmem:[#allocation2 + $0x50] sm:$0xff] }
 0x153   : > { %v948_v28 = vadd.f32 %v1912_v27, %v909_v25  ;;  %v949_v29 = vadd.f32 %v1912_v27, %v910_v26  ;;  %v950_v33 = vadd.f32 %v1912_v27, %v911_v30  ;;  %v951_v34 = vadd.f32 %v1912_v27, %v912_v31  ;;  %v914_v35 = vld [vmem:[#allocation2 + $0x68] sm:$0xff]  ;;  %v915_v37 = vld [vmem:[#allocation2 + $0x30] sm:$0xff]  ;;  %v917_v43 = vld [vmem:[#allocation2 + $0x80] sm:$0xff] }
 0x154   : > { %v952_v36 = vadd.f32 %v1912_v27, %v913_v32  ;;  %v916_v38 = vld [vmem:[#allocation2 + $0x48] sm:$0xff]  ;;  %v953_v41 = vadd.f32 %v1912_v27, %v914_v35  ;;  %v954_v42 = vadd.f32 %v1912_v27, %v915_v37  ;;  %v920_v50 = vld [vmem:[#allocation2 + $0xb8] sm:$0xff]  ;;  %v921_v51 = vld [vmem:[#allocation2 + $0x60] sm:$0xff]  ;;  %v956_v55 = vadd.f32 %v1912_v27, %v917_v43 }
 0x155   : > { %v980_v39 = vmax.f32 %v948_v28, 0.0  ;;  %v981_v40 = vmax.f32 %v949_v29, 0.0  ;;  %v918_v44 = vld [vmem:[#allocation2 + $0x88] sm:$0xff]  ;;  %v982_v46 = vmax.f32 %v950_v33, 0.0  ;;  %v983_v47 = vmax.f32 %v951_v34, 0.0  ;;  %v924_v62 = vld [vmem:[#allocation2 + $0x78] sm:$0xff] }
 0x156   : > { %v919_v45 = vld [vmem:[#allocation2 + $0xe8] sm:$0xff]  ;;  %v984_v48 = vmax.f32 %v952_v36, 0.0  ;;  %v955_v49 = vadd.f32 %v1912_v27, %v916_v38  ;;  %v985_v53 = vmax.f32 %v953_v41, 0.0  ;;  %v986_v54 = vmax.f32 %v954_v42, 0.0  ;;  %v925_v3 = vld [vmem:[#allocation2 + $0x38] sm:$0xff]  ;;  %v927_v9 = vld [vmem:[#allocation2 + $0x40] sm:$0xff] }
 0x157   : > { %v1399_v52 = vpack.c.bf16 %v981_v40, %v980_v39  ;;  %v922_v56 = vld [vmem:[#allocation2 + $0xf0] sm:$0xff]  ;;  %v1404_v57 = vpack.c.bf16 %v983_v47, %v982_v46  ;;  %v957_v59 = vadd.f32 %v1912_v27, %v918_v44  ;;  %v958_v60 = vadd.f32 %v1912_v27, %v919_v45  ;;  %v923_v61 = vld [vmem:[#allocation2 + $0x8] sm:$0xff]  ;;  %v926_v4 = vld [vmem:[#allocation2 + $0x58] sm:$0xff] }
 0x158   : > { %v987_v58 = vmax.f32 %v955_v49, 0.0  ;;  %v1409_v63 = vpack.c.bf16 %v985_v53, %v984_v48  ;;  %v988_v0 = vmax.f32 %v956_v55, 0.0  ;;  %v959_v1 = vadd.f32 %v1912_v27, %v920_v50  ;;  %v928_v14 = vld [vmem:[#allocation2 + $0xc8] sm:$0xff]  ;;  %v929_v19 = vld [vmem:[#allocation2 + $0xe0] sm:$0xff]  ;;  %v930_v20 = vld [vmem:[#allocation2 + $0x90] sm:$0xff] }
 0x159   : > { %1400 = vst [vmem:[%s1879_s29] sm:$0xff] %v1399_v52   ;;  %v960_v2 = vadd.f32 %v1912_v27, %v921_v51  ;;  %1476 = vst [vmem:[%s1879_s29 + $0x8] sm:$0xff] %v1404_v57   ;;  %v989_v6 = vmax.f32 %v957_v59, 0.0  ;;  %v990_v7 = vmax.f32 %v958_v60, 0.0  ;;  %v961_v8 = vadd.f32 %v1912_v27, %v922_v56  ;;  %v931_v25 = vld [vmem:[#allocation2 + $0x70] sm:$0xff]  ;;  %v932_v26 = vld [vmem:[#allocation2 + $0xc0] sm:$0xff] }
 0x15a   : > { %v1414_v5 = vpack.c.bf16 %v987_v58, %v986_v54  ;;  %1477 = vst [vmem:[%s1879_s29 + $0x10] sm:$0xff] %v1409_v63   ;;  %v991_v10 = vmax.f32 %v959_v1, 0.0  ;;  %v962_v12 = vadd.f32 %v1912_v27, %v923_v61  ;;  %v963_v13 = vadd.f32 %v1912_v27, %v924_v62  ;;  %v933_v32 = vld [vmem:[#allocation2 + $0xa8] sm:$0xff]  ;;  %v934_v33 = vld [vmem:[#allocation2 + $0xd0] sm:$0xff]  ;;  %v937_v48 = vld [vmem:[#allocation2 + $0xa0] sm:$0xff] }
 0x15b   : > { %v992_v11 = vmax.f32 %v960_v2, 0.0  ;;  %v1419_v15 = vpack.c.bf16 %v989_v6, %v988_v0  ;;  %v993_v16 = vmax.f32 %v961_v8, 0.0  ;;  %v964_v17 = vadd.f32 %v1912_v27, %v925_v3  ;;  %v935_v38 = vld [vmem:[#allocation2 + $0x10] sm:$0xff]  ;;  %v936_v43 = vld [vmem:[#allocation2 + $0x28] sm:$0xff]  ;;  %v938_v49 = vld [vmem:[#allocation2 + $0xf8] sm:$0xff] }
 0x15c   : > { %1478 = vst [vmem:[%s1879_s29 + $0x18] sm:$0xff] %v1414_v5   ;;  %v965_v18 = vadd.f32 %v1912_v27, %v926_v4  ;;  %v1424_v21 = vpack.c.bf16 %v991_v10, %v990_v7  ;;  %v994_v22 = vmax.f32 %v962_v12, 0.0  ;;  %v995_v23 = vmax.f32 %v963_v13, 0.0  ;;  %v939_v54 = vld [vmem:[#allocation2 + $0x20] sm:$0xff]  ;;  %v940_v55 = vld [vmem:[#allocation2 + $0x98] sm:$0xff] }
 0x15d   : > { %v966_v24 = vadd.f32 %v1912_v27, %v927_v9  ;;  %1479 = vst [vmem:[%s1879_s29 + $0x20] sm:$0xff] %v1419_v15   ;;  %v1429_v28 = vpack.c.bf16 %v993_v16, %v992_v11  ;;  %v996_v29 = vmax.f32 %v964_v17, 0.0  ;;  %v967_v31 = vadd.f32 %v1912_v27, %v928_v14 }
 0x15e   : > { %v997_v30 = vmax.f32 %v965_v18, 0.0  ;;  %1480 = vst [vmem:[%s1879_s29 + $0x28] sm:$0xff] %v1424_v21   ;;  %v1434_v34 = vpack.c.bf16 %v995_v23, %v994_v22  ;;  %v968_v36 = vadd.f32 %v1912_v27, %v929_v19  ;;  %v969_v37 = vadd.f32 %v1912_v27, %v930_v20 }
 0x15f   : > { %v998_v35 = vmax.f32 %v966_v24, 0.0  ;;  %1481 = vst [vmem:[%s1879_s29 + $0x30] sm:$0xff] %v1429_v28   ;;  %v999_v40 = vmax.f32 %v967_v31, 0.0  ;;  %v970_v41 = vadd.f32 %v1912_v27, %v931_v25  ;;  %v971_v42 = vadd.f32 %v1912_v27, %v932_v26 }
 0x160   : > { %v1439_v39 = vpack.c.bf16 %v997_v30, %v996_v29  ;;  %1482 = vst [vmem:[%s1879_s29 + $0x38] sm:$0xff] %v1434_v34   ;;  %v1000_v44 = vmax.f32 %v968_v36, 0.0  ;;  %v1001_v45 = vmax.f32 %v969_v37, 0.0  ;;  %v972_v46 = vadd.f32 %v1912_v27, %v933_v32 }
 0x161   : > { %v973_v47 = vadd.f32 %v1912_v27, %v934_v33  ;;  %v1444_v50 = vpack.c.bf16 %v999_v40, %v998_v35  ;;  %v1002_v51 = vmax.f32 %v970_v41, 0.0  ;;  %v1003_v52 = vmax.f32 %v971_v42, 0.0 }
 0x162   : > { %1483 = vst [vmem:[%s1879_s29 + $0x40] sm:$0xff] %v1439_v39   ;;  %v974_v53 = vadd.f32 %v1912_v27, %v935_v38  ;;  %v1449_v56 = vpack.c.bf16 %v1001_v45, %v1000_v44  ;;  %v1004_v57 = vmax.f32 %v972_v46, 0.0  ;;  %v975_v59 = vadd.f32 %v1912_v27, %v936_v43 }
 0x163   : > { %v1005_v58 = vmax.f32 %v973_v47, 0.0  ;;  %1484 = vst [vmem:[%s1879_s29 + $0x48] sm:$0xff] %v1444_v50   ;;  %v1454_v60 = vpack.c.bf16 %v1003_v52, %v1002_v51  ;;  %v976_v62 = vadd.f32 %v1912_v27, %v937_v48  ;;  %v977_v63 = vadd.f32 %v1912_v27, %v938_v49 }
 0x164   : > { %v1006_v61 = vmax.f32 %v974_v53, 0.0  ;;  %1485 = vst [vmem:[%s1879_s29 + $0x50] sm:$0xff] %v1449_v56   ;;  %v1007_v1 = vmax.f32 %v975_v59, 0.0  ;;  %v978_v2 = vadd.f32 %v1912_v27, %v939_v54  ;;  %v979_v3 = vadd.f32 %v1912_v27, %v940_v55 }
 0x165   : > { %v1459_v0 = vpack.c.bf16 %v1005_v58, %v1004_v57  ;;  %1486 = vst [vmem:[%s1879_s29 + $0x58] sm:$0xff] %v1454_v60   ;;  %v1008_v4 = vmax.f32 %v976_v62, 0.0  ;;  %v1009_v5 = vmax.f32 %v977_v63, 0.0 }
 0x166   : > { %v1464_v6 = vpack.c.bf16 %v1007_v1, %v1006_v61  ;;  %v1010_v7 = vmax.f32 %v978_v2, 0.0  ;;  %v1011_v8 = vmax.f32 %v979_v3, 0.0 }
 0x167   : > { %1487 = vst [vmem:[%s1879_s29 + $0x60] sm:$0xff] %v1459_v0   ;;  %v1469_v9 = vpack.c.bf16 %v1009_v5, %v1008_v4 }
 0x168   : > { %1488 = vst [vmem:[%s1879_s29 + $0x68] sm:$0xff] %v1464_v6   ;;  %v1474_v10 = vpack.c.bf16 %v1011_v8, %v1010_v7 }
 0x169   : > { %1489 = vst [vmem:[%s1879_s29 + $0x70] sm:$0xff] %v1469_v9  }
 0x16a   : > { %1490 = vst [vmem:[%s1879_s29 + $0x78] sm:$0xff] %v1474_v10  }
 0x16b PF: > { %s13_s18 = sadd.s32 1, %s1715_s18   ;;  %s1987_s12 = smov %s1695_s13 }
 0x16c   : > { %p10_p0 = scmp.ge.s32.totalorder %s13_s18, 8   ;;  %s1988_s13 = smov %s1789_s25 }
 0x16d   : > { %s1989_s14 = smov %s1707_s16  ;;  %s1990_s15 = smov %s1711_s17 }
 0x16e   : > { %s1991_s16 = smov %s1994_s19  ;;  %s1992_s17 = smov %s1998_s20 }
 0x16f   :  { %12 = sbr.rel (!%p10_p0) target bundleno = 4 (0x4), region = 122 }

// kernel: fcn_head_forward.7
= control target key start
LH: loop header
LB: loop body
LE: loop exit
PB: predicated region body
PF: predicated region fallthrough
CT: control target
= control target key end

     0   :  { %s1180_s12 = smov 0   ;;  %s1182_s13 = smov 0   ;;  %s1330_s0 = inlined_call_operand.vmem [shape: bf16[512,128], index: 0, kind: input, shape index: {}]   ;;  %s1331_s1 = inlined_call_operand.vmem [shape: bf16[128,128], index: 1, kind: input, shape index: {}]   ;;  %s1332_s2 = inlined_call_operand.vmem [shape: f32[1,128], index: 2, kind: input, shape index: {}]   ;;  %s1333_s3 = inlined_call_operand.vmem [shape: f32[512,128], index: 3, kind: output, shape index: {}]  }
   0x1   :  { %s1184_s14 = smov 0  }
   0x2 LB: > { %s32_s15 = sadd.s32 1, %s1154_s13  ;;  %p968_p0 = scmp.ge.s32.totalorder %s1158_s14, 1  ;;  %s1158_s14 = sphi %s1184_s14, %s13_s14   ;;  %s1154_s13 = sphi %s1182_s13, %s1335_s13   ;;  %s1150_s12 = sphi %s1180_s12, %s1334_s12  }
   0x3   : > { %p34_p1 = scmp.ge.s32.totalorder %s32_s15, 2  ;;  %p188_p2 = scmp.lt.s32.totalorder %s1158_s14, 3 }
   0x5   : > { %s1337_s15 = smov (%p34_p1, %s32_s15), 0  ;;  %p189_p3 = pnand %p968_p0, %p188_p2 }
   0x6   : > { %s969_s18 = sshll.u32 (!%p189_p3), %s1150_s12, 5 }
   0x7   : > { %192 = sbr.rel (%p189_p3) target bundleno = 271 (0x10f), region = 32  ;;  %p230_p4 = scmp.lt.s32.totalorder (!%p189_p3), %s969_s18, 63 }
   0xc   : > { %v1112_v0 = vld [vmem:[%s1331_s1 + $0x38] sm:$0xff]   ;;  %v1113_v1 = vld [vmem:[%s1331_s1 + $0x30] sm:$0xff]   ;;  %s1339_s18 = smov (!%p230_p4, %s969_s18), 63  ;;  %v1114_v2 = vld [vmem:[%s1331_s1 + $0x28] sm:$0xff]  }
   0xd   : > { %1024 = vmatprep.subr.bf16.mxu0 %v1112_v0  ;;  %1072 = vmatprep.subr.bf16.mxu1 %v1112_v0  ;;  %s970_s23 = sshll.u32 %s1339_s18, 2  ;;  %v1115_v3 = vld [vmem:[%s1331_s1 + $0x20] sm:$0xff]   ;;  %v1116_v6 = vld [vmem:[%s1331_s1 + $0x18] sm:$0xff]   ;;  %v1117_v7 = vld [vmem:[%s1331_s1 + $0x10] sm:$0xff]   ;;  %s972_s10 = sshll.u32 %s1339_s18, 3 }
   0xe   : > { %1025 = vmatpush3.bf16.msra.mxu0 %v1112_v0  ;;  %1080 = vmatpush3.bf16.msra.mxu1 %v1112_v0  ;;  %s1213_s26 = scalar_lea.vmem %s1330_s0, %s970_s23  ;;  %v1118_v8 = vld [vmem:[%s1331_s1 + $0x8] sm:$0xff]   ;;  %v1119_v9 = vld [vmem:[%s1331_s1] sm:$0xff]   ;;  %s1255_s19 = scalar_lea.vmem %s1333_s3, %s972_s10 }
   0xf   : > { %1026 = vmatprep.subr.bf16.mxu0 %v1113_v1  ;;  %1073 = vmatprep.subr.bf16.mxu1 %v1113_v1  ;;  %v1120_v4 = vld [vmem:[%s1213_s26] sm:$0xff]   ;;  %v1122_v10 = vld [vmem:[%s1213_s26 + $0x8] sm:$0xff]   ;;  %v1124_v12 = vld [vmem:[%s1213_s26 + $0x10] sm:$0xff]  }
  0x10   : > { %v1121_v5 = vld [vmem:[%s1213_s26 + $0x40] sm:$0xff]   ;;  %1040 = vmatprep.mubr.bf16.mxu0 %v1120_v4  ;;  %v1123_v11 = vld [vmem:[%s1213_s26 + $0x48] sm:$0xff]   ;;  %v1125_v13 = vld [vmem:[%s1213_s26 + $0x50] sm:$0xff]  }
  0x11   : > { %1056 = vmatprep.mubr.bf16.mxu1 %v1121_v5  ;;  %v1126_v14 = vld [vmem:[%s1213_s26 + $0x18] sm:$0xff]   ;;  %v1128_v16 = vld [vmem:[%s1213_s26 + $0x20] sm:$0xff]   ;;  %v1130_v18 = vld [vmem:[%s1213_s26 + $0x28] sm:$0xff]  }
  0x12   : > { %1027 = vmatpush3.bf16.msra.mxu0 %v1113_v1  ;;  %1081 = vmatpush3.bf16.msra.mxu1 %v1113_v1  ;;  %v1127_v15 = vld [vmem:[%s1213_s26 + $0x58] sm:$0xff]   ;;  %v1129_v17 = vld [vmem:[%s1213_s26 + $0x60] sm:$0xff]   ;;  %v1131_v19 = vld [vmem:[%s1213_s26 + $0x68] sm:$0xff]  }
  0x13   : > { %1028 = vmatprep.subr.bf16.mxu0 %v1114_v2  ;;  %1074 = vmatprep.subr.bf16.mxu1 %v1114_v2  ;;  %v1132_v20 = vld [vmem:[%s1213_s26 + $0x30] sm:$0xff]   ;;  %v1134_v22 = vld [vmem:[%s1213_s26 + $0x38] sm:$0xff]   ;;  %v1250_v24 = vld [vmem:[%s1332_s2] ss:$0 sm:$0xff] }
  0x14   : > { %v1133_v21 = vld [vmem:[%s1213_s26 + $0x70] sm:$0xff]   ;;  %v1135_v23 = vld [vmem:[%s1213_s26 + $0x78] sm:$0xff]  }
  0x16   : > { %1029 = vmatpush3.bf16.msra.mxu0 %v1114_v2  ;;  %1082 = vmatpush3.bf16.msra.mxu1 %v1114_v2 }
  0x17   : > { %1030 = vmatprep.subr.bf16.mxu0 %v1115_v3  ;;  %1075 = vmatprep.subr.bf16.mxu1 %v1115_v3 }
  0x1a   : > { %1031 = vmatpush3.bf16.msra.mxu0 %v1115_v3  ;;  %1083 = vmatpush3.bf16.msra.mxu1 %v1115_v3 }
  0x1b   : > { %1032 = vmatprep.subr.bf16.mxu0 %v1116_v6  ;;  %1076 = vmatprep.subr.bf16.mxu1 %v1116_v6 }
  0x1e   : > { %1033 = vmatpush3.bf16.msra.mxu0 %v1116_v6  ;;  %1084 = vmatpush3.bf16.msra.mxu1 %v1116_v6 }
  0x1f   : > { %1034 = vmatprep.subr.bf16.mxu0 %v1117_v7  ;;  %1077 = vmatprep.subr.bf16.mxu1 %v1117_v7 }
  0x22   : > { %1035 = vmatpush3.bf16.msra.mxu0 %v1117_v7  ;;  %1085 = vmatpush3.bf16.msra.mxu1 %v1117_v7 }
  0x23   : > { %1036 = vmatprep.subr.bf16.mxu0 %v1118_v8  ;;  %1078 = vmatprep.subr.bf16.mxu1 %v1118_v8 }
  0x26   : > { %1037 = vmatpush3.bf16.msra.mxu0 %v1118_v8  ;;  %1086 = vmatpush3.bf16.msra.mxu1 %v1118_v8 }
  0x27   : > { %1038 = vmatprep.subr.bf16.mxu0 %v1119_v9  ;;  %1079 = vmatprep.subr.bf16.mxu1 %v1119_v9 }
  0x2a   : > { %1039 = vmatpush3.bf16.msra.mxu0 %v1119_v9  ;;  %1087 = vmatpush3.bf16.msra.mxu1 %v1119_v9 }
  0x2d   : > { %1041 = vmatmul.mubr.bf16.vlgmr.msra.gmra.mxu0 %v1122_v10  ;;  %1057 = vmatmul.mubr.bf16.vlgmr.msra.gmra.mxu1 %v1123_v11 }
  0x2e   : > { %1044 = vmatprep.mubr.bf16.mxu0 %v1124_v12  ;;  %1060 = vmatprep.mubr.bf16.mxu1 %v1125_v13 }
  0x35   : > { %1045 = vmatmul.mubr.bf16.gmra.mxu0 %v1126_v14  ;;  %1061 = vmatmul.mubr.bf16.gmra.mxu1 %v1127_v15 }
  0x36   : > { %1048 = vmatprep.mubr.bf16.mxu0 %v1128_v16  ;;  %1064 = vmatprep.mubr.bf16.mxu1 %v1129_v17 }
  0x3d   : > { %1049 = vmatmul.mubr.bf16.gmra.mxu0 %v1130_v18  ;;  %1065 = vmatmul.mubr.bf16.gmra.mxu1 %v1131_v19 }
  0x3e   : > { %1052 = vmatprep.mubr.bf16.mxu0 %v1132_v20  ;;  %1068 = vmatprep.mubr.bf16.mxu1 %v1133_v21 }
  0x45   : > { %1053 = vmatmul.mubr.bf16.gmra.mxu0 %v1134_v22  ;;  %1069 = vmatmul.mubr.bf16.gmra.mxu1 %v1135_v23 }
  0xed   : > { %v1042_v25 = vpop.f32.mrf.mxu0  ;;  %v1058_v26 = vpop.f32.mrf.mxu1 }
  0xee   : > { %v789_v27 = vadd.f32 %v1042_v25, %v1250_v24  ;;  %v805_v28 = vadd.f32 %v1058_v26, %v1250_v24 }
  0xef   : > { %v554_v29 = vpop.f32.mrf.mxu0  ;;  %v618_v30 = vpop.f32.mrf.mxu1 }
  0xf0   : > { %821 = vst [vmem:[%s1255_s19 + $0x10] sm:$0xff] %v789_v27  ;;  %837 = vst [vmem:[%s1255_s19 + $0x90] sm:$0xff] %v805_v28  ;;  %v787_v31 = vadd.f32 %v1250_v24, %v554_v29  ;;  %v803_v32 = vadd.f32 %v1250_v24, %v618_v30 }
  0xf1   : > { %v1043_v33 = vpop.f32.mrf.mxu0  ;;  %v1059_v34 = vpop.f32.mrf.mxu1 }
  0xf2   : > { %819 = vst [vmem:[%s1255_s19] sm:$0xff] %v787_v31  ;;  %835 = vst [vmem:[%s1255_s19 + $0x80] sm:$0xff] %v803_v32  ;;  %v790_v35 = vadd.f32 %v1043_v33, %v1250_v24  ;;  %v806_v36 = vadd.f32 %v1059_v34, %v1250_v24 }
  0xf3   : > { %v557_v37 = vpop.f32.mrf.mxu0  ;;  %v621_v38 = vpop.f32.mrf.mxu1 }
  0xf4   : > { %822 = vst [vmem:[%s1255_s19 + $0x18] sm:$0xff] %v790_v35  ;;  %838 = vst [vmem:[%s1255_s19 + $0x98] sm:$0xff] %v806_v36  ;;  %v788_v39 = vadd.f32 %v1250_v24, %v557_v37  ;;  %v804_v40 = vadd.f32 %v1250_v24, %v621_v38 }
  0xf5   : > { %v1046_v41 = vpop.f32.mrf.mxu0  ;;  %v1062_v42 = vpop.f32.mrf.mxu1 }
  0xf6   : > { %820 = vst [vmem:[%s1255_s19 + $0x8] sm:$0xff] %v788_v39  ;;  %836 = vst [vmem:[%s1255_s19 + $0x88] sm:$0xff] %v804_v40  ;;  %v793_v43 = vadd.f32 %v1046_v41, %v1250_v24  ;;  %v809_v44 = vadd.f32 %v1062_v42, %v1250_v24 }
  0xf7   : > { %v570_v45 = vpop.f32.mrf.mxu0  ;;  %v634_v46 = vpop.f32.mrf.mxu1 }
  0xf8   : > { %825 = vst [vmem:[%s1255_s19 + $0x30] sm:$0xff] %v793_v43  ;;  %841 = vst [vmem:[%s1255_s19 + $0xb0] sm:$0xff] %v809_v44  ;;  %v791_v47 = vadd.f32 %v1250_v24, %v570_v45  ;;  %v807_v48 = vadd.f32 %v1250_v24, %v634_v46 }
  0xf9   : > { %v1047_v49 = vpop.f32.mrf.mxu0  ;;  %v1063_v50 = vpop.f32.mrf.mxu1 }
  0xfa   : > { %823 = vst [vmem:[%s1255_s19 + $0x20] sm:$0xff] %v791_v47  ;;  %839 = vst [vmem:[%s1255_s19 + $0xa0] sm:$0xff] %v807_v48  ;;  %v794_v51 = vadd.f32 %v1047_v49, %v1250_v24  ;;  %v810_v52 = vadd.f32 %v1063_v50, %v1250_v24 }
  0xfb   : > { %v573_v53 = vpop.f32.mrf.mxu0  ;;  %v637_v54 = vpop.f32.mrf.mxu1 }
  0xfc   : > { %826 = vst [vmem:[%s1255_s19 + $0x38] sm:$0xff] %v794_v51  ;;  %842 = vst [vmem:[%s1255_s19 + $0xb8] sm:$0xff] %v810_v52  ;;  %v792_v55 = vadd.f32 %v1250_v24, %v573_v53  ;;  %v808_v56 = vadd.f32 %v1250_v24, %v637_v54 }
  0xfd   : > { %v1050_v57 = vpop.f32.mrf.mxu0  ;;  %v1066_v58 = vpop.f32.mrf.mxu1 }
  0xfe   : > { %824 = vst [vmem:[%s1255_s19 + $0x28] sm:$0xff] %v792_v55  ;;  %840 = vst [vmem:[%s1255_s19 + $0xa8] sm:$0xff] %v808_v56  ;;  %v797_v59 = vadd.f32 %v1050_v57, %v1250_v24  ;;  %v813_v60 = vadd.f32 %v1066_v58, %v1250_v24 }
  0xff   : > { %v586_v61 = vpop.f32.mrf.mxu0  ;;  %v650_v62 = vpop.f32.mrf.mxu1 }
 0x100   : > { %829 = vst [vmem:[%s1255_s19 + $0x50] sm:$0xff] %v797_v59  ;;  %845 = vst [vmem:[%s1255_s19 + $0xd0] sm:$0xff] %v813_v60  ;;  %v795_v63 = vadd.f32 %v1250_v24, %v586_v61  ;;  %v811_v0 = vadd.f32 %v1250_v24, %v650_v62 }
 0x101   : > { %v1051_v1 = vpop.f32.mrf.mxu0  ;;  %v1067_v2 = vpop.f32.mrf.mxu1 }
 0x102   : > { %827 = vst [vmem:[%s1255_s19 + $0x40] sm:$0xff] %v795_v63  ;;  %843 = vst [vmem:[%s1255_s19 + $0xc0] sm:$0xff] %v811_v0  ;;  %v798_v3 = vadd.f32 %v1051_v1, %v1250_v24  ;;  %v814_v4 = vadd.f32 %v1067_v2, %v1250_v24 }
 0x103   : > { %v589_v5 = vpop.f32.mrf.mxu0  ;;  %v653_v6 = vpop.f32.mrf.mxu1 }
 0x104   : > { %830 = vst [vmem:[%s1255_s19 + $0x58] sm:$0xff] %v798_v3  ;;  %846 = vst [vmem:[%s1255_s19 + $0xd8] sm:$0xff] %v814_v4  ;;  %v796_v7 = vadd.f32 %v1250_v24, %v589_v5  ;;  %v812_v8 = vadd.f32 %v1250_v24, %v653_v6 }
 0x105   : > { %v1054_v9 = vpop.f32.mrf.mxu0  ;;  %v1070_v10 = vpop.f32.mrf.mxu1 }
 0x106   : > { %828 = vst [vmem:[%s1255_s19 + $0x48] sm:$0xff] %v796_v7  ;;  %844 = vst [vmem:[%s1255_s19 + $0xc8] sm:$0xff] %v812_v8  ;;  %v801_v11 = vadd.f32 %v1054_v9, %v1250_v24  ;;  %v817_v12 = vadd.f32 %v1070_v10, %v1250_v24 }
 0x107   : > { %v602_v13 = vpop.f32.mrf.mxu0  ;;  %v666_v14 = vpop.f32.mrf.mxu1 }
 0x108   : > { %833 = vst [vmem:[%s1255_s19 + $0x70] sm:$0xff] %v801_v11  ;;  %849 = vst [vmem:[%s1255_s19 + $0xf0] sm:$0xff] %v817_v12  ;;  %v799_v15 = vadd.f32 %v1250_v24, %v602_v13  ;;  %v815_v16 = vadd.f32 %v1250_v24, %v666_v14 }
 0x109   : > { %v1055_v17 = vpop.f32.mrf.mxu0  ;;  %v1071_v18 = vpop.f32.mrf.mxu1 }
 0x10a   : > { %831 = vst [vmem:[%s1255_s19 + $0x60] sm:$0xff] %v799_v15  ;;  %847 = vst [vmem:[%s1255_s19 + $0xe0] sm:$0xff] %v815_v16  ;;  %v802_v19 = vadd.f32 %v1055_v17, %v1250_v24  ;;  %v818_v20 = vadd.f32 %v1071_v18, %v1250_v24 }
 0x10b   : > { %v605_v21 = vpop.f32.mrf.mxu0  ;;  %v669_v22 = vpop.f32.mrf.mxu1 }
 0x10c   : > { %834 = vst [vmem:[%s1255_s19 + $0x78] sm:$0xff] %v802_v19  ;;  %850 = vst [vmem:[%s1255_s19 + $0xf8] sm:$0xff] %v818_v20  ;;  %v800_v23 = vadd.f32 %v1250_v24, %v605_v21  ;;  %v816_v25 = vadd.f32 %v1250_v24, %v669_v22 }
 0x10e   : > { %832 = vst [vmem:[%s1255_s19 + $0x68] sm:$0xff] %v800_v23  ;;  %848 = vst [vmem:[%s1255_s19 + $0xe8] sm:$0xff] %v816_v25 }
 0x10f PF: > { %s13_s14 = sadd.s32 1, %s1158_s14   ;;  %s1334_s12 = smov %s1154_s13 }
 0x110   : > { %p10_p5 = scmp.ge.s32.totalorder %s13_s14, 4   ;;  %s1335_s13 = smov %s1337_s15 }
 0x112   :  { %12 = sbr.rel (!%p10_p5) target bundleno = 2 (0x2), region = 76 }

</bundles_post_ra>
